<compile_context>
chip_gen: v6e
topology: v6e:2x2x1
jax: 0.10.0
libtpu: 0.0.40
codegen_flags: <defaults>
</compile_context>

<pallas_src>
import functools

import jax
import jax.numpy as jnp
from jax.experimental import pallas as pl
from jax.experimental.pallas import tpu as pltpu

EPS = 1e-5  # PyTorch GroupNorm default eps


def basic_block_kernel(x_ref, gamma_ref, beta_ref, cgmap_ref, gcmap_ref,
                       w_ref, b_ref, mask_ref, o_ref, *, num_groups, H, W):
    # Shapes (channel-major, NCHW end-to-end):
    #   x_ref:     (1, Cin, H*W)   input activations for one sample (f32)
    #   gamma_ref: (Cin, 1)        GroupNorm weight
    #   beta_ref:  (Cin, 1)        GroupNorm bias
    #   cgmap_ref: (Cin, G)        one-hot channel->group map (f32)
    #   gcmap_ref: (G, Cin)        one-hot group->channel map (f32)
    #   w_ref:     (9, Cout, Cin)  conv tap weights, bf16
    #   b_ref:     (Cout, 1)       conv bias
    #   mask_ref:  (9, H*W)        per-tap boundary masks (0/1), bf16
    #   o_ref:     (1, Cout, H*W)  lane-dense output slab
    Cin = x_ref.shape[1]
    Cout = b_ref.shape[0]
    G = num_groups
    cg = Cin // G
    HW = H * W

    xs = x_ref[0].astype(jnp.float32)                                    # (Cin, HW)

    # ---- GroupNorm (two-pass: mean, then variance of centered data) ----
    # Reductions run along the lane axis; tiny one-hot matmuls aggregate per group.
    inv_n = 1.0 / float(HW * cg)
    ch_sum = jnp.sum(xs, axis=1, keepdims=True)                          # (Cin, 1)
    g_mean = jnp.dot(gcmap_ref[...], ch_sum,
                     preferred_element_type=jnp.float32) * inv_n         # (G, 1)
    mean_c = jnp.dot(cgmap_ref[...], g_mean,
                     preferred_element_type=jnp.float32)                 # (Cin, 1)
    xc = xs - mean_c                                                     # (Cin, HW)
    ch_ss = jnp.sum(xc * xc, axis=1, keepdims=True)                      # (Cin, 1)
    g_var = jnp.dot(gcmap_ref[...], ch_ss,
                    preferred_element_type=jnp.float32) * inv_n          # (G, 1)
    inv_g = jax.lax.rsqrt(g_var + EPS)                                   # (G, 1)
    inv_c = jnp.dot(cgmap_ref[...], inv_g,
                    preferred_element_type=jnp.float32)                  # (Cin, 1)

    y = xc * (inv_c * gamma_ref[...]) + beta_ref[...]                    # (Cin, HW)

    # ---- SiLU (f32; sigmoid goes to the EUP) ----
    y = y * jax.nn.sigmoid(y)

    # ---- Dropout(p=0.0) is the identity ----

    # ---- Conv2d 3x3 'same': 9 accumulating (Cout,Cin)@(Cin,HW) dots ----
    # Each tap operand is a static circular lane shift of y plus a precomputed
    # boundary mask that zeroes out-of-image neighbors.  Operands stay lane-dense.
    # TODO(synk): pltpu.roll(y_bf, shift, axis=1) is the single-XLU-op alternative
    # to jnp.roll's slice+concat lowering.
    y_bf = y.astype(jnp.bfloat16)
    acc = jnp.zeros((Cout, HW), jnp.float32)
    for t in range(9):
        dy, dx = t // 3, t % 3
        s = (dy - 1) * W + (dx - 1)            # static per-tap pixel shift
        if s == 0:
            tap = y_bf                         # center tap: no shift, mask all-ones
        else:
            tap = jnp.roll(y_bf, -s, axis=1) * mask_ref[t:t + 1, :]
        acc = acc + jnp.dot(w_ref[t], tap, preferred_element_type=jnp.float32)

    o_ref[0] = (acc + b_ref[...]).astype(o_ref.dtype)


def basic_block_forward(x_nchw, gamma, beta, w_oihw, bias):
    """x_nchw: (N, Cin, H, W). Returns (N, Cout, H, W)."""
    N, Cin, H, W = x_nchw.shape
    Cout = w_oihw.shape[0]
    assert Cin % 16 == 0, "GroupNorm(num_channels // 16, ...) requires Cin % 16 == 0"
    G = Cin // 16
    cg = 16
    HW = H * W

    # NCHW is already channel-major: flattening the spatial dims is a free reshape.
    x_flat = x_nchw.reshape(N, Cin, HW)

    # Conv weights (Cout, Cin, 3, 3) -> 9 per-tap (Cout, Cin) matrices, bf16 for the MXU.
    w_taps = jnp.transpose(w_oihw, (2, 3, 0, 1)).reshape(9, Cout, Cin).astype(jnp.bfloat16)
    gamma2 = gamma.reshape(Cin, 1).astype(jnp.float32)
    beta2 = beta.reshape(Cin, 1).astype(jnp.float32)
    bias2 = bias.reshape(Cout, 1).astype(jnp.float32)

    # Loop-invariant group membership one-hot maps (built once).
    ch_group = jnp.arange(Cin, dtype=jnp.int32) // cg
    cg_map = (ch_group[:, None] == jnp.arange(G, dtype=jnp.int32)[None, :]).astype(jnp.float32)
    gc_map = cg_map.T

    # Per-tap boundary masks over flattened pixels (built once), bf16.
    hh = jnp.arange(H, dtype=jnp.int32)
    ww = jnp.arange(W, dtype=jnp.int32)
    mask_list = []
    for dy in range(3):
        for dx in range(3):
            row_ok = (hh + (dy - 1) >= 0) & (hh + (dy - 1) < H)
            col_ok = (ww + (dx - 1) >= 0) & (ww + (dx - 1) < W)
            mask_list.append((row_ok[:, None] & col_ok[None, :]).reshape(HW))
    masks = jnp.stack(mask_list, axis=0).astype(jnp.bfloat16)            # (9, HW)

    kernel = functools.partial(basic_block_kernel, num_groups=G, H=H, W=W)

    cost = pl.CostEstimate(
        flops=2 * N * HW * 9 * Cin * Cout + 10 * N * HW * Cin,
        transcendentals=N * HW * Cin,
        bytes_accessed=N * HW * (Cin + Cout) * 4 + 9 * Cin * Cout * 2
                       + 9 * HW * 2 + 4 * (2 * Cin + Cout))

    # TODO(synk): for large H/W/Cin (e.g. diffusion resolutions on v7x's 64 MiB VMEM),
    # add an H-strip grid axis with a 1-row halo + two-pass GroupNorm partial sums;
    # unnecessary at these small shapes (per-step footprint well under 1 MiB).
    out = pl.pallas_call(
        kernel,
        out_shape=jax.ShapeDtypeStruct((N, Cout, HW), x_nchw.dtype),
        grid=(N,),
        in_specs=[
            pl.BlockSpec((1, Cin, HW), lambda n: (n, 0, 0)),
            pl.BlockSpec((Cin, 1), lambda n: (0, 0)),
            pl.BlockSpec((Cin, 1), lambda n: (0, 0)),
            pl.BlockSpec((Cin, G), lambda n: (0, 0)),
            pl.BlockSpec((G, Cin), lambda n: (0, 0)),
            pl.BlockSpec((9, Cout, Cin), lambda n: (0, 0, 0)),
            pl.BlockSpec((Cout, 1), lambda n: (0, 0)),
            pl.BlockSpec((9, HW), lambda n: (0, 0)),
        ],
        out_specs=pl.BlockSpec((1, Cout, HW), lambda n: (n, 0, 0)),
        compiler_params=pltpu.CompilerParams(
            dimension_semantics=("parallel",)),
        cost_estimate=cost,
    )(x_flat, gamma2, beta2, cg_map, gc_map, w_taps, bias2, masks)

    return out.reshape(N, Cout, H, W)   # free reshape, output already NCHW-ordered


def reference_forward(x_nchw, gamma, beta, w_oihw, bias):
    """Pure-JAX f32 reference matching PyTorch semantics (NCHW)."""
    N, C, H, W = x_nchw.shape
    G = C // 16
    xg = x_nchw.reshape(N, G, C // G, H, W).astype(jnp.float32)
    mean = xg.mean(axis=(2, 3, 4), keepdims=True)
    var = xg.var(axis=(2, 3, 4), keepdims=True)
    y = (xg - mean) / jnp.sqrt(var + EPS)
    y = y.reshape(N, C, H, W)
    y = y * gamma[None, :, None, None] + beta[None, :, None, None]
    y = y * jax.nn.sigmoid(y)
    out = jax.lax.conv_general_dilated(
        y, w_oihw, window_strides=(1, 1), padding="SAME",
        dimension_numbers=("NCHW", "OIHW", "NCHW"))
    return out + bias[None, :, None, None]


if __name__ == "__main__":
    # Small shapes consistent with the module: GroupNorm(C // 16) needs Cin % 16 == 0.
    N, Cin, Cout, H, W = 2, 32, 32, 16, 16

    key = jax.random.PRNGKey(0)
    kx, kw, kb, kg, kbeta = jax.random.split(key, 5)
    x = jax.random.normal(kx, (N, Cin, H, W), dtype=jnp.float32)
    w = jax.random.normal(kw, (Cout, Cin, 3, 3), dtype=jnp.float32) * 0.1
    b = jax.random.normal(kb, (Cout,), dtype=jnp.float32) * 0.1
    gamma = 1.0 + 0.1 * jax.random.normal(kg, (Cin,), dtype=jnp.float32)
    beta = 0.1 * jax.random.normal(kbeta, (Cin,), dtype=jnp.float32)

    out = jax.block_until_ready(basic_block_forward(x, gamma, beta, w, b))
    ref = reference_forward(x, gamma, beta, w, b)

    assert out.shape == (N, Cout, H, W), out.shape
    # bf16 conv operands / activations (f32 accumulation) -> tolerance loosened vs f32 ref.
    max_err = float(jnp.max(jnp.abs(out - ref)))
    assert jnp.allclose(out, ref, atol=5e-2, rtol=5e-2), max_err

    print("KERNEL_OK")
</pallas_src>

<mosaic_0001>
module attributes {stable_mosaic.version = 11 : i64} {
  func.func @basic_block_kernel(%arg0: i32, %arg1: memref<1x32x256xf32, #tpu.memory_space<vmem>>, %arg2: memref<32x1xf32, #tpu.memory_space<vmem>>, %arg3: memref<32x1xf32, #tpu.memory_space<vmem>>, %arg4: memref<32x2xf32, #tpu.memory_space<vmem>>, %arg5: memref<2x32xf32, #tpu.memory_space<vmem>>, %arg6: memref<9x32x32xbf16, #tpu.memory_space<vmem>>, %arg7: memref<32x1xf32, #tpu.memory_space<vmem>>, %arg8: memref<9x256xbf16, #tpu.memory_space<vmem>>, %arg9: memref<1x32x256xf32, #tpu.memory_space<vmem>>) attributes {dimension_semantics = [#tpu.dimension_semantics<parallel>], iteration_bounds = array<i64: 2>, scalar_prefetch = 0 : i64, scratch_operands = 0 : i64, tpu.core_type = #tpu.core_type<tc>, window_params = [{transform_indices = @transform_0, window_bounds = array<i64: 1, 32, 256>}, {pipeline_mode = #tpu.pipeline_mode<synchronous>, transform_indices = @transform_1, window_bounds = array<i64: 32, 1>}, {pipeline_mode = #tpu.pipeline_mode<synchronous>, transform_indices = @transform_2, window_bounds = array<i64: 32, 1>}, {pipeline_mode = #tpu.pipeline_mode<synchronous>, transform_indices = @transform_3, window_bounds = array<i64: 32, 2>}, {pipeline_mode = #tpu.pipeline_mode<synchronous>, transform_indices = @transform_4, window_bounds = array<i64: 2, 32>}, {pipeline_mode = #tpu.pipeline_mode<synchronous>, transform_indices = @transform_5, window_bounds = array<i64: 9, 32, 32>}, {pipeline_mode = #tpu.pipeline_mode<synchronous>, transform_indices = @transform_6, window_bounds = array<i64: 32, 1>}, {pipeline_mode = #tpu.pipeline_mode<synchronous>, transform_indices = @transform_7, window_bounds = array<i64: 9, 256>}, {transform_indices = @transform_8, window_bounds = array<i64: 1, 32, 256>}]} {
    %c0 = arith.constant 0 : index
    %c0_0 = arith.constant 0 : index
    %c0_1 = arith.constant 0 : index
    %0 = vector.load %arg1[%c0, %c0_0, %c0_1] : memref<1x32x256xf32, #tpu.memory_space<vmem>>, vector<1x32x256xf32>
    %1 = vector.shape_cast %0 : vector<1x32x256xf32> to vector<32x256xf32>
    %cst = arith.constant dense<0.000000e+00> : vector<32xf32>
    %2 = vector.multi_reduction <add>, %1, %cst [1] : vector<32x256xf32> to vector<32xf32>
    %3 = vector.shape_cast %2 : vector<32xf32> to vector<32x1xf32>
    %c0_2 = arith.constant 0 : index
    %c0_3 = arith.constant 0 : index
    %4 = vector.load %arg5[%c0_2, %c0_3] : memref<2x32xf32, #tpu.memory_space<vmem>>, vector<2x32xf32>
    %cst_4 = arith.constant dense<0.000000e+00> : vector<2x1xf32>
    %5 = tpu.matmul %4, %3, %cst_4 {dimension_numbers = #tpu.dot_dimension_numbers<[1], [0], [0], [1], [0, 0, 1, 1], [], []>} : vector<2x32xf32>, vector<32x1xf32>, vector<2x1xf32> -> vector<2x1xf32>
    %cst_5 = arith.constant 2.44140625E-4 : f32
    %6 = vector.broadcast %cst_5 : f32 to vector<2x1xf32>
    %7 = arith.mulf %5, %6 : vector<2x1xf32>
    %c0_6 = arith.constant 0 : index
    %c0_7 = arith.constant 0 : index
    %8 = vector.load %arg4[%c0_6, %c0_7] : memref<32x2xf32, #tpu.memory_space<vmem>>, vector<32x2xf32>
    %cst_8 = arith.constant dense<0.000000e+00> : vector<32x1xf32>
    %9 = tpu.matmul %8, %7, %cst_8 {dimension_numbers = #tpu.dot_dimension_numbers<[1], [0], [0], [1], [0, 0, 1, 1], [], []>} : vector<32x2xf32>, vector<2x1xf32>, vector<32x1xf32> -> vector<32x1xf32>
    %10 = vector.broadcast %9 : vector<32x1xf32> to vector<32x256xf32>
    %11 = arith.subf %1, %10 : vector<32x256xf32>
    %12 = arith.mulf %11, %11 : vector<32x256xf32>
    %cst_9 = arith.constant dense<0.000000e+00> : vector<32xf32>
    %13 = vector.multi_reduction <add>, %12, %cst_9 [1] : vector<32x256xf32> to vector<32xf32>
    %14 = vector.shape_cast %13 : vector<32xf32> to vector<32x1xf32>
    %c0_10 = arith.constant 0 : index
    %c0_11 = arith.constant 0 : index
    %15 = vector.load %arg5[%c0_10, %c0_11] : memref<2x32xf32, #tpu.memory_space<vmem>>, vector<2x32xf32>
    %cst_12 = arith.constant dense<0.000000e+00> : vector<2x1xf32>
    %16 = tpu.matmul %15, %14, %cst_12 {dimension_numbers = #tpu.dot_dimension_numbers<[1], [0], [0], [1], [0, 0, 1, 1], [], []>} : vector<2x32xf32>, vector<32x1xf32>, vector<2x1xf32> -> vector<2x1xf32>
    %cst_13 = arith.constant 2.44140625E-4 : f32
    %17 = vector.broadcast %cst_13 : f32 to vector<2x1xf32>
    %18 = arith.mulf %16, %17 : vector<2x1xf32>
    %cst_14 = arith.constant 9.99999974E-6 : f32
    %19 = vector.broadcast %cst_14 : f32 to vector<2x1xf32>
    %20 = arith.addf %18, %19 : vector<2x1xf32>
    %21 = math.rsqrt %20 : vector<2x1xf32>
    %c0_15 = arith.constant 0 : index
    %c0_16 = arith.constant 0 : index
    %22 = vector.load %arg4[%c0_15, %c0_16] : memref<32x2xf32, #tpu.memory_space<vmem>>, vector<32x2xf32>
    %cst_17 = arith.constant dense<0.000000e+00> : vector<32x1xf32>
    %23 = tpu.matmul %22, %21, %cst_17 {dimension_numbers = #tpu.dot_dimension_numbers<[1], [0], [0], [1], [0, 0, 1, 1], [], []>} : vector<32x2xf32>, vector<2x1xf32>, vector<32x1xf32> -> vector<32x1xf32>
    %c0_18 = arith.constant 0 : index
    %c0_19 = arith.constant 0 : index
    %24 = vector.load %arg2[%c0_18, %c0_19] : memref<32x1xf32, #tpu.memory_space<vmem>>, vector<32x1xf32>
    %25 = arith.mulf %23, %24 : vector<32x1xf32>
    %26 = vector.broadcast %25 : vector<32x1xf32> to vector<32x256xf32>
    %27 = arith.mulf %11, %26 : vector<32x256xf32>
    %c0_20 = arith.constant 0 : index
    %c0_21 = arith.constant 0 : index
    %28 = vector.load %arg3[%c0_20, %c0_21] : memref<32x1xf32, #tpu.memory_space<vmem>>, vector<32x1xf32>
    %29 = vector.broadcast %28 : vector<32x1xf32> to vector<32x256xf32>
    %30 = arith.addf %27, %29 : vector<32x256xf32>
    %31 = arith.negf %30 : vector<32x256xf32>
    %32 = math.exp %31 : vector<32x256xf32>
    %cst_22 = arith.constant 1.000000e+00 : f32
    %33 = vector.broadcast %cst_22 : f32 to vector<32x256xf32>
    %34 = arith.addf %33, %32 : vector<32x256xf32>
    %35 = arith.divf %33, %34 : vector<32x256xf32>
    %36 = arith.mulf %30, %35 : vector<32x256xf32>
    %37 = arith.truncf %36 : vector<32x256xf32> to vector<32x256xbf16>
    %cst_23 = arith.constant 0.000000e+00 : f32
    %38 = vector.broadcast %cst_23 : f32 to vector<32x256xf32>
    %39 = vector.extract_strided_slice %37 {offsets = [0, 239], sizes = [32, 17], strides = [1, 1]} : vector<32x256xbf16> to vector<32x17xbf16>
    %40 = vector.extract_strided_slice %37 {offsets = [0, 0], sizes = [32, 239], strides = [1, 1]} : vector<32x256xbf16> to vector<32x239xbf16>
    %41 = tpu.concatenate %39, %40 in 1 : vector<32x17xbf16>, vector<32x239xbf16> -> vector<32x256xbf16>
    %c0_24 = arith.constant 0 : index
    %c0_25 = arith.constant 0 : index
    %42 = vector.load %arg8[%c0_24, %c0_25] : memref<9x256xbf16, #tpu.memory_space<vmem>>, vector<1x256xbf16>
    %43 = vector.broadcast %42 : vector<1x256xbf16> to vector<32x256xbf16>
    %44 = arith.mulf %41, %43 : vector<32x256xbf16>
    %c0_26 = arith.constant 0 : index
    %c0_27 = arith.constant 0 : index
    %c0_28 = arith.constant 0 : index
    %45 = vector.load %arg6[%c0_26, %c0_27, %c0_28] : memref<9x32x32xbf16, #tpu.memory_space<vmem>>, vector<1x32x32xbf16>
    %46 = vector.shape_cast %45 : vector<1x32x32xbf16> to vector<32x32xbf16>
    %cst_29 = arith.constant dense<0.000000e+00> : vector<32x256xf32>
    %47 = tpu.matmul %46, %44, %cst_29 {dimension_numbers = #tpu.dot_dimension_numbers<[1], [0], [0], [1], [0, 0, 1, 1], [], []>} : vector<32x32xbf16>, vector<32x256xbf16>, vector<32x256xf32> -> vector<32x256xf32>
    %48 = arith.addf %38, %47 : vector<32x256xf32>
    %49 = vector.extract_strided_slice %37 {offsets = [0, 240], sizes = [32, 16], strides = [1, 1]} : vector<32x256xbf16> to vector<32x16xbf16>
    %50 = vector.extract_strided_slice %37 {offsets = [0, 0], sizes = [32, 240], strides = [1, 1]} : vector<32x256xbf16> to vector<32x240xbf16>
    %51 = tpu.concatenate %49, %50 in 1 : vector<32x16xbf16>, vector<32x240xbf16> -> vector<32x256xbf16>
    %c1 = arith.constant 1 : index
    %c0_30 = arith.constant 0 : index
    %52 = vector.load %arg8[%c1, %c0_30] : memref<9x256xbf16, #tpu.memory_space<vmem>>, vector<1x256xbf16>
    %53 = vector.broadcast %52 : vector<1x256xbf16> to vector<32x256xbf16>
    %54 = arith.mulf %51, %53 : vector<32x256xbf16>
    %c1_31 = arith.constant 1 : index
    %c0_32 = arith.constant 0 : index
    %c0_33 = arith.constant 0 : index
    %55 = vector.load %arg6[%c1_31, %c0_32, %c0_33] : memref<9x32x32xbf16, #tpu.memory_space<vmem>>, vector<1x32x32xbf16>
    %56 = vector.shape_cast %55 : vector<1x32x32xbf16> to vector<32x32xbf16>
    %cst_34 = arith.constant dense<0.000000e+00> : vector<32x256xf32>
    %57 = tpu.matmul %56, %54, %cst_34 {dimension_numbers = #tpu.dot_dimension_numbers<[1], [0], [0], [1], [0, 0, 1, 1], [], []>} : vector<32x32xbf16>, vector<32x256xbf16>, vector<32x256xf32> -> vector<32x256xf32>
    %58 = arith.addf %48, %57 : vector<32x256xf32>
    %59 = vector.extract_strided_slice %37 {offsets = [0, 241], sizes = [32, 15], strides = [1, 1]} : vector<32x256xbf16> to vector<32x15xbf16>
    %60 = vector.extract_strided_slice %37 {offsets = [0, 0], sizes = [32, 241], strides = [1, 1]} : vector<32x256xbf16> to vector<32x241xbf16>
    %61 = tpu.concatenate %59, %60 in 1 : vector<32x15xbf16>, vector<32x241xbf16> -> vector<32x256xbf16>
    %c2 = arith.constant 2 : index
    %c0_35 = arith.constant 0 : index
    %62 = vector.load %arg8[%c2, %c0_35] : memref<9x256xbf16, #tpu.memory_space<vmem>>, vector<1x256xbf16>
    %63 = vector.broadcast %62 : vector<1x256xbf16> to vector<32x256xbf16>
    %64 = arith.mulf %61, %63 : vector<32x256xbf16>
    %c2_36 = arith.constant 2 : index
    %c0_37 = arith.constant 0 : index
    %c0_38 = arith.constant 0 : index
    %65 = vector.load %arg6[%c2_36, %c0_37, %c0_38] : memref<9x32x32xbf16, #tpu.memory_space<vmem>>, vector<1x32x32xbf16>
    %66 = vector.shape_cast %65 : vector<1x32x32xbf16> to vector<32x32xbf16>
    %cst_39 = arith.constant dense<0.000000e+00> : vector<32x256xf32>
    %67 = tpu.matmul %66, %64, %cst_39 {dimension_numbers = #tpu.dot_dimension_numbers<[1], [0], [0], [1], [0, 0, 1, 1], [], []>} : vector<32x32xbf16>, vector<32x256xbf16>, vector<32x256xf32> -> vector<32x256xf32>
    %68 = arith.addf %58, %67 : vector<32x256xf32>
    %69 = vector.extract_strided_slice %37 {offsets = [0, 255], sizes = [32, 1], strides = [1, 1]} : vector<32x256xbf16> to vector<32x1xbf16>
    %70 = vector.extract_strided_slice %37 {offsets = [0, 0], sizes = [32, 255], strides = [1, 1]} : vector<32x256xbf16> to vector<32x255xbf16>
    %71 = tpu.concatenate %69, %70 in 1 : vector<32x1xbf16>, vector<32x255xbf16> -> vector<32x256xbf16>
    %c3 = arith.constant 3 : index
    %c0_40 = arith.constant 0 : index
    %72 = vector.load %arg8[%c3, %c0_40] : memref<9x256xbf16, #tpu.memory_space<vmem>>, vector<1x256xbf16>
    %73 = vector.broadcast %72 : vector<1x256xbf16> to vector<32x256xbf16>
    %74 = arith.mulf %71, %73 : vector<32x256xbf16>
    %c3_41 = arith.constant 3 : index
    %c0_42 = arith.constant 0 : index
    %c0_43 = arith.constant 0 : index
    %75 = vector.load %arg6[%c3_41, %c0_42, %c0_43] : memref<9x32x32xbf16, #tpu.memory_space<vmem>>, vector<1x32x32xbf16>
    %76 = vector.shape_cast %75 : vector<1x32x32xbf16> to vector<32x32xbf16>
    %cst_44 = arith.constant dense<0.000000e+00> : vector<32x256xf32>
    %77 = tpu.matmul %76, %74, %cst_44 {dimension_numbers = #tpu.dot_dimension_numbers<[1], [0], [0], [1], [0, 0, 1, 1], [], []>} : vector<32x32xbf16>, vector<32x256xbf16>, vector<32x256xf32> -> vector<32x256xf32>
    %78 = arith.addf %68, %77 : vector<32x256xf32>
    %c4 = arith.constant 4 : index
    %c0_45 = arith.constant 0 : index
    %c0_46 = arith.constant 0 : index
    %79 = vector.load %arg6[%c4, %c0_45, %c0_46] : memref<9x32x32xbf16, #tpu.memory_space<vmem>>, vector<1x32x32xbf16>
    %80 = vector.shape_cast %79 : vector<1x32x32xbf16> to vector<32x32xbf16>
    %cst_47 = arith.constant dense<0.000000e+00> : vector<32x256xf32>
    %81 = tpu.matmul %80, %37, %cst_47 {dimension_numbers = #tpu.dot_dimension_numbers<[1], [0], [0], [1], [0, 0, 1, 1], [], []>} : vector<32x32xbf16>, vector<32x256xbf16>, vector<32x256xf32> -> vector<32x256xf32>
    %82 = arith.addf %78, %81 : vector<32x256xf32>
    %83 = vector.extract_strided_slice %37 {offsets = [0, 1], sizes = [32, 255], strides = [1, 1]} : vector<32x256xbf16> to vector<32x255xbf16>
    %84 = vector.extract_strided_slice %37 {offsets = [0, 0], sizes = [32, 1], strides = [1, 1]} : vector<32x256xbf16> to vector<32x1xbf16>
    %85 = tpu.concatenate %83, %84 in 1 : vector<32x255xbf16>, vector<32x1xbf16> -> vector<32x256xbf16>
    %c5 = arith.constant 5 : index
    %c0_48 = arith.constant 0 : index
    %86 = vector.load %arg8[%c5, %c0_48] : memref<9x256xbf16, #tpu.memory_space<vmem>>, vector<1x256xbf16>
    %87 = vector.broadcast %86 : vector<1x256xbf16> to vector<32x256xbf16>
    %88 = arith.mulf %85, %87 : vector<32x256xbf16>
    %c5_49 = arith.constant 5 : index
    %c0_50 = arith.constant 0 : index
    %c0_51 = arith.constant 0 : index
    %89 = vector.load %arg6[%c5_49, %c0_50, %c0_51] : memref<9x32x32xbf16, #tpu.memory_space<vmem>>, vector<1x32x32xbf16>
    %90 = vector.shape_cast %89 : vector<1x32x32xbf16> to vector<32x32xbf16>
    %cst_52 = arith.constant dense<0.000000e+00> : vector<32x256xf32>
    %91 = tpu.matmul %90, %88, %cst_52 {dimension_numbers = #tpu.dot_dimension_numbers<[1], [0], [0], [1], [0, 0, 1, 1], [], []>} : vector<32x32xbf16>, vector<32x256xbf16>, vector<32x256xf32> -> vector<32x256xf32>
    %92 = arith.addf %82, %91 : vector<32x256xf32>
    %93 = vector.extract_strided_slice %37 {offsets = [0, 15], sizes = [32, 241], strides = [1, 1]} : vector<32x256xbf16> to vector<32x241xbf16>
    %94 = vector.extract_strided_slice %37 {offsets = [0, 0], sizes = [32, 15], strides = [1, 1]} : vector<32x256xbf16> to vector<32x15xbf16>
    %95 = tpu.concatenate %93, %94 in 1 : vector<32x241xbf16>, vector<32x15xbf16> -> vector<32x256xbf16>
    %c6 = arith.constant 6 : index
    %c0_53 = arith.constant 0 : index
    %96 = vector.load %arg8[%c6, %c0_53] : memref<9x256xbf16, #tpu.memory_space<vmem>>, vector<1x256xbf16>
    %97 = vector.broadcast %96 : vector<1x256xbf16> to vector<32x256xbf16>
    %98 = arith.mulf %95, %97 : vector<32x256xbf16>
    %c6_54 = arith.constant 6 : index
    %c0_55 = arith.constant 0 : index
    %c0_56 = arith.constant 0 : index
    %99 = vector.load %arg6[%c6_54, %c0_55, %c0_56] : memref<9x32x32xbf16, #tpu.memory_space<vmem>>, vector<1x32x32xbf16>
    %100 = vector.shape_cast %99 : vector<1x32x32xbf16> to vector<32x32xbf16>
    %cst_57 = arith.constant dense<0.000000e+00> : vector<32x256xf32>
    %101 = tpu.matmul %100, %98, %cst_57 {dimension_numbers = #tpu.dot_dimension_numbers<[1], [0], [0], [1], [0, 0, 1, 1], [], []>} : vector<32x32xbf16>, vector<32x256xbf16>, vector<32x256xf32> -> vector<32x256xf32>
    %102 = arith.addf %92, %101 : vector<32x256xf32>
    %103 = vector.extract_strided_slice %37 {offsets = [0, 16], sizes = [32, 240], strides = [1, 1]} : vector<32x256xbf16> to vector<32x240xbf16>
    %104 = vector.extract_strided_slice %37 {offsets = [0, 0], sizes = [32, 16], strides = [1, 1]} : vector<32x256xbf16> to vector<32x16xbf16>
    %105 = tpu.concatenate %103, %104 in 1 : vector<32x240xbf16>, vector<32x16xbf16> -> vector<32x256xbf16>
    %c7 = arith.constant 7 : index
    %c0_58 = arith.constant 0 : index
    %106 = vector.load %arg8[%c7, %c0_58] : memref<9x256xbf16, #tpu.memory_space<vmem>>, vector<1x256xbf16>
    %107 = vector.broadcast %106 : vector<1x256xbf16> to vector<32x256xbf16>
    %108 = arith.mulf %105, %107 : vector<32x256xbf16>
    %c7_59 = arith.constant 7 : index
    %c0_60 = arith.constant 0 : index
    %c0_61 = arith.constant 0 : index
    %109 = vector.load %arg6[%c7_59, %c0_60, %c0_61] : memref<9x32x32xbf16, #tpu.memory_space<vmem>>, vector<1x32x32xbf16>
    %110 = vector.shape_cast %109 : vector<1x32x32xbf16> to vector<32x32xbf16>
    %cst_62 = arith.constant dense<0.000000e+00> : vector<32x256xf32>
    %111 = tpu.matmul %110, %108, %cst_62 {dimension_numbers = #tpu.dot_dimension_numbers<[1], [0], [0], [1], [0, 0, 1, 1], [], []>} : vector<32x32xbf16>, vector<32x256xbf16>, vector<32x256xf32> -> vector<32x256xf32>
    %112 = arith.addf %102, %111 : vector<32x256xf32>
    %113 = vector.extract_strided_slice %37 {offsets = [0, 17], sizes = [32, 239], strides = [1, 1]} : vector<32x256xbf16> to vector<32x239xbf16>
    %114 = vector.extract_strided_slice %37 {offsets = [0, 0], sizes = [32, 17], strides = [1, 1]} : vector<32x256xbf16> to vector<32x17xbf16>
    %115 = tpu.concatenate %113, %114 in 1 : vector<32x239xbf16>, vector<32x17xbf16> -> vector<32x256xbf16>
    %c8 = arith.constant 8 : index
    %c0_63 = arith.constant 0 : index
    %116 = vector.load %arg8[%c8, %c0_63] : memref<9x256xbf16, #tpu.memory_space<vmem>>, vector<1x256xbf16>
    %117 = vector.broadcast %116 : vector<1x256xbf16> to vector<32x256xbf16>
    %118 = arith.mulf %115, %117 : vector<32x256xbf16>
    %c8_64 = arith.constant 8 : index
    %c0_65 = arith.constant 0 : index
    %c0_66 = arith.constant 0 : index
    %119 = vector.load %arg6[%c8_64, %c0_65, %c0_66] : memref<9x32x32xbf16, #tpu.memory_space<vmem>>, vector<1x32x32xbf16>
    %120 = vector.shape_cast %119 : vector<1x32x32xbf16> to vector<32x32xbf16>
    %cst_67 = arith.constant dense<0.000000e+00> : vector<32x256xf32>
    %121 = tpu.matmul %120, %118, %cst_67 {dimension_numbers = #tpu.dot_dimension_numbers<[1], [0], [0], [1], [0, 0, 1, 1], [], []>} : vector<32x32xbf16>, vector<32x256xbf16>, vector<32x256xf32> -> vector<32x256xf32>
    %122 = arith.addf %112, %121 : vector<32x256xf32>
    %c0_68 = arith.constant 0 : index
    %c0_69 = arith.constant 0 : index
    %123 = vector.load %arg7[%c0_68, %c0_69] : memref<32x1xf32, #tpu.memory_space<vmem>>, vector<32x1xf32>
    %124 = vector.broadcast %123 : vector<32x1xf32> to vector<32x256xf32>
    %125 = arith.addf %122, %124 : vector<32x256xf32>
    %c0_70 = arith.constant 0 : index
    %c0_71 = arith.constant 0 : index
    %c0_72 = arith.constant 0 : index
    %126 = vector.load %arg9[%c0_70, %c0_71, %c0_72] : memref<1x32x256xf32, #tpu.memory_space<vmem>>, vector<1x32x256xf32>
    %127 = vector.shape_cast %126 : vector<1x32x256xf32> to vector<32x256xf32>
    %128 = vector.shape_cast %125 : vector<32x256xf32> to vector<1x32x256xf32>
    tpu.vector_store %arg9[%c0_70, %c0_71, %c0_72], %128 {strides = array<i32>} : memref<1x32x256xf32, #tpu.memory_space<vmem>>, vector<1x32x256xf32>,
    return
  }
  func.func @transform_0(%arg0: i32) -> (i32, i32, i32) {
    %c0_i32 = arith.constant 0 : i32
    %c0_i32_0 = arith.constant 0 : i32
    %c0_i32_1 = arith.constant 0 : i32
    return %arg0, %c0_i32, %c0_i32_0 : i32, i32, i32
  }
  func.func @transform_1(%arg0: i32) -> (i32, i32) {
    %c0_i32 = arith.constant 0 : i32
    %c0_i32_0 = arith.constant 0 : i32
    %c0_i32_1 = arith.constant 0 : i32
    return %c0_i32, %c0_i32_0 : i32, i32
  }
  func.func @transform_2(%arg0: i32) -> (i32, i32) {
    %c0_i32 = arith.constant 0 : i32
    %c0_i32_0 = arith.constant 0 : i32
    %c0_i32_1 = arith.constant 0 : i32
    return %c0_i32, %c0_i32_0 : i32, i32
  }
  func.func @transform_3(%arg0: i32) -> (i32, i32) {
    %c0_i32 = arith.constant 0 : i32
    %c0_i32_0 = arith.constant 0 : i32
    %c0_i32_1 = arith.constant 0 : i32
    return %c0_i32, %c0_i32_0 : i32, i32
  }
  func.func @transform_4(%arg0: i32) -> (i32, i32) {
    %c0_i32 = arith.constant 0 : i32
    %c0_i32_0 = arith.constant 0 : i32
    %c0_i32_1 = arith.constant 0 : i32
    return %c0_i32, %c0_i32_0 : i32, i32
  }
  func.func @transform_5(%arg0: i32) -> (i32, i32, i32) {
    %c0_i32 = arith.constant 0 : i32
    %c0_i32_0 = arith.constant 0 : i32
    %c0_i32_1 = arith.constant 0 : i32
    %c0_i32_2 = arith.constant 0 : i32
    return %c0_i32, %c0_i32_0, %c0_i32_1 : i32, i32, i32
  }
  func.func @transform_6(%arg0: i32) -> (i32, i32) {
    %c0_i32 = arith.constant 0 : i32
    %c0_i32_0 = arith.constant 0 : i32
    %c0_i32_1 = arith.constant 0 : i32
    return %c0_i32, %c0_i32_0 : i32, i32
  }
  func.func @transform_7(%arg0: i32) -> (i32, i32) {
    %c0_i32 = arith.constant 0 : i32
    %c0_i32_0 = arith.constant 0 : i32
    %c0_i32_1 = arith.constant 0 : i32
    return %c0_i32, %c0_i32_0 : i32, i32
  }
  func.func @transform_8(%arg0: i32) -> (i32, i32, i32) {
    %c0_i32 = arith.constant 0 : i32
    %c0_i32_0 = arith.constant 0 : i32
    %c0_i32_1 = arith.constant 0 : i32
    return %arg0, %c0_i32, %c0_i32_0 : i32, i32, i32
  }
}

</mosaic_0001>

<bundles_post_ra>
// kernel: tpu_custom_call.1
= control target key start
LH: loop header
LB: loop body
LE: loop exit
PB: predicated region body
PF: predicated region fallthrough
CT: control target
= control target key end

     0   :  { %13 = vsyncpa [#allocation3], 0  ;;  %s3077_s0 = inlined_call_operand.vmem [shape: f32[2,32,256], index: 0, kind: input, shape index: {}]   ;;  %s3078_s1 = inlined_call_operand.vmem [shape: f32[32,1], index: 1, kind: input, shape index: {}]   ;;  %s3079_s2 = inlined_call_operand.vmem [shape: f32[32,1], index: 2, kind: input, shape index: {}]   ;;  %s3080_s3 = inlined_call_operand.vmem [shape: f32[32,2], index: 3, kind: input, shape index: {}]   ;;  %s3081_s4 = inlined_call_operand.hbm [shape: f32[2,32], index: 4, kind: input, shape index: {}]   ;;  %s3082_s5 = inlined_call_operand.hbm [shape: bf16[9,32,32], index: 5, kind: input, shape index: {}]   ;;  %s3083_s6 = inlined_call_operand.vmem [shape: f32[32,1], index: 6, kind: input, shape index: {}]   ;;  %s3084_s7 = inlined_call_operand.vmem [shape: bf16[9,256], index: 7, kind: input, shape index: {}]   ;;  %s3085_s8 = inlined_call_operand.hbm [shape: f32[2,32,256], index: 8, kind: output, shape index: {}]  }
   0x1   :  { %14 = vsyncpa [#allocation6], 0 }
   0x2   :  { %15 = vsyncpa [#allocation4], 0 }
   0x3   :  { %17 = vsyncpa [#allocation4 + $0x1], 0  ;;  %s2551_s27 = smov 0   ;;  %s2553_s28 = smov 0  }
   0x4   :  { %s2555_s29 = smov 0   ;;  %s2557_s30 = smov 0  }
   0x5 LB: > { %s2572_s9 = sadd.s32 4294967295, %s2487_s30   ;;  %s2087_s10 = sadd.s32 4294967294, %s2487_s30   ;;  %s2487_s30 = sphi %s2557_s30, %s3103_s30   ;;  %s2483_s29 = sphi %s2555_s29, %s3102_s29   ;;  %s2479_s28 = sphi %s2553_s28, %s3101_s28   ;;  %s2475_s27 = sphi %s2551_s27, %s3100_s27  }
   0x6   : > { %s2576_s11 = sadd.s32 1, %s2487_s30   ;;  %s203_s12 = sadd.s32 1, %s2483_s29 }
   0x7   : > { %s200_s13 = ssub.s32 %s2487_s30, %s2576_s11  ;;  %p213_p0 = scmp.ne.s32.totalorder %s2483_s29, %s2479_s28 }
   0x8   : > { %p201_p1 = scmp.eq.s32.totalorder %s200_s13, 0  ;;  %p214_p2 = scmp.eq.s32.totalorder %s2572_s9, 1 }
   0x9   : > { %p219_p3 = scmp.ne.s32.totalorder %s2479_s28, %s2475_s27  ;;  %p220_p4 = scmp.eq.s32.totalorder %s2087_s10, 1 }
   0xa   : > { %s2587_s14 = scalar_select %p201_p1, %s2483_s29, %s203_s12  }
   0xb   : > { %p2589_p5 = por %p214_p2, %p213_p0  ;;  %p2593_p6 = por %p220_p4, %p219_p3 }
   0xc   : > { %p2088_p7 = scmp.ge.s32.totalorder %s2487_s30, 1  ;;  %p227_p8 = scmp.lt.s32.totalorder %s2487_s30, 3 }
   0xd   : > { %s3089_s15 = scalar_select %p2589_p5, 1, 0 }
   0xe   : > { %s3090_s16 = scalar_select %p2593_p6, 1, 0 }
   0xf   : > { %p3086_p9 = scmp.eq.s32.totalorder %s2572_s9, 0  ;;  %p2600_p10 = pnand %p2088_p7, %p227_p8 }
  0x10   : > { %s2489_s18 = smov [#allocation2]   ;;  %s2490_s20 = smov [#allocation5]  }
  0x11   : > { %s3091_s17 = scalar_select %p2600_p10, 1, 0 }
  0x12   : > { %s249_s19 = sshll.u32 %s2489_s18, 4  ;;  %p2239_p11 = pneg %p2600_p10  ;;  %s250_s19 = int_to_ptr.vmem [resolvable:$true] %s249_s19 }
  0x13   : > { %s259_s21 = sshll.u32 %s2490_s20, 4  ;;  %s2378_s23 = scalar_lea.vmem %s250_s19, 32  ;;  %s260_s21 = int_to_ptr.vmem [resolvable:$true] %s259_s21 }
  0x14   : > { %p2608_p12 = pnand %p3086_p9, %p2239_p11  ;;  %p2379_p0 = scmp.ne.s32.totalorder %s250_s19, %s2378_s23 }
  0x15   : > { %p2386_p3 = scmp.lt.s32.totalorder %s250_s19, %s250_s19  ;;  %p2387_p4 = scmp.lt.s32.totalorder %s2378_s23, %s2378_s23 }
  0x16   : > { %p2369_p13 = pneg %p2608_p12 }
  0x17   : > { %p2388_p7 = por %p2387_p4, %p2386_p3 }
  0x18   : > { %p2381_p1 = pnand %p2379_p0, %p2369_p13 }
  0x1a   : > { %p2382_p2 = pneg %p2381_p1 }
  0x1c   : > { %p2389_p8 = pnand %p2388_p7, %p2382_p2 }
  0x1e   : > { %2392 = shalt.err (!%p2389_p8)
}
  0x1f   : > { %2242 = dma.hbm_to_vmem [thread:$0]  (!%p2608_p12), %s3081_s4, 32, %s250_s19, [#allocation3]  }
  0x20   : > { %s2404_s26 = scalar_lea.vmem %s260_s21, 2304  ;;  %p2412_p0 = scmp.lt.s32.totalorder %s260_s21, %s260_s21 }
  0x21   : > { %p2405_p11 = scmp.ne.s32.totalorder %s260_s21, %s2404_s26  ;;  %p2413_p1 = scmp.lt.s32.totalorder %s2404_s26, %s2404_s26 }
  0x23   : > { %p2407_p9 = pnand %p2405_p11, %p2369_p13  ;;  %p2414_p5 = por %p2413_p1, %p2412_p0 }
  0x25   : > { %p2408_p6 = pneg %p2407_p9 }
  0x27   : > { %p2415_p10 = pnand %p2414_p5, %p2408_p6 }
  0x29   : > { %2418 = shalt.err (!%p2415_p10)
}
  0x2a   : > { %s2491_s10 = smov 64   ;;  %s2492_s12 = smov 4  }
  0x2b   : > { %2245 = dma.hbm_to_vmem [thread:$0]  (!%p2608_p12), %s3082_s5, 2304, %s260_s21, [#allocation6], %s2491_s10, %s2491_s10, %s2492_s12  }
  0x2c   : > { %p3093_p2 = scmp.ne.s32.totalorder %s3091_s17, 0 }
  0x2d   : > { %p3094_p3 = scmp.eq.s32.totalorder (!%p3093_p2), %s2572_s9, 0 }
  0x2e   : > { %289 = sbr.rel (%p3093_p2) target bundleno = 1878 (0x756), region = 52 }
  0x33   : > { %2462 = dma.done.wait (%p3094_p3), [#allocation3], 32   ;;  %p3095_p9 = pmov %p3094_p3 }
  0x34   : > { %p3096_p5 = pmov %p3094_p3 }
  0x35   : > { %2464 = vsyncadd (%p3095_p9), [#allocation3], 4294967264 }
  0x36   : > { %2466 = dma.done.wait (%p3096_p5), [#allocation6], 2304   ;;  %p3097_p6 = pmov %p3094_p3 }
  0x37   : > { %p327_p10 = scmp.lt.s32.totalorder %s2572_s9, 1  ;;  %v2493_v0 = vmov 0.0   ;;  %vm2494_vm0 = vmmov 0   ;;  %v2668_v17 = vld [vmem:[#allocation2] sm:$0x3]  ;;  %vm354_vm1 = vcmask 261120  }
  0x38   : > { %2468 = vsyncadd (%p3097_p6), [#allocation6], 4294964992  ;;  %2191 = vmatprep.subr.mxu0 %v2493_v0  ;;  %2199 = vmatprep.mubr.msk.f32.mxu0 %vm2494_vm0, %v2493_v0  ;;  %v2679_v18 = vld [vmem:[%s3080_s3] sm:$0xff]  ;;  %vm433_vm2 = vcmask 15360   ;;  %v2495_v19 = vmov 0   ;;  %vm446_vm3 = vcmask 1041408  }
  0x39   : > { %s328_s17 = scalar_select %p327_p10, %s2572_s9, 1  ;;  %2204 = vmatprep.mubr.msk.f32.mxu1 %vm433_vm2, %v2679_v18  ;;  %2304 = vset.pattern.permute.xlu1 %v2495_v19  ;;  %v2688_v23 = vld [vmem:[%s3080_s3 + $0x8] sm:$0xff]  ;;  %v2694_v24 = vld [vmem:[%s3080_s3 + $0x10] sm:$0xff]  ;;  %v2704_v25 = vld [vmem:[%s3080_s3 + $0x18] sm:$0xff]  ;;  %vm934_vm4 = vcmask 130048   ;;  %vm884_vm5 = vcmask 138240  }
  0x3a   : > { %2303 = vset.pattern.permute.xlu0 %v2495_v19  ;;  %v782_v54 = vld [vmem:[%s3079_s2 + $0x10] sm:$0xff]  ;;  %v783_v55 = vld [vmem:[%s3079_s2 + $0x18] sm:$0xff]  ;;  %s2496_s21 = smov 16   ;;  %s2498_s23 = smov 15   ;;  %vm1117_vm6 = vcmask 121856   ;;  %vm1245_vm7 = vcmask 7168  }
  0x3b   : > { %s2169_s19 = sshll.u32 %s328_s17, 6  ;;  %s2499_s24 = smov 1   ;;  %vm1449_vm8 = vcmask 1039360   ;;  %vm1579_vm9 = vcmask 924672   ;;  %vm1707_vm10 = vcmask 916480   ;;  %vm1829_vm11 = vcmask 908288  }
  0x3c   : > { %s331_s22 = scalar_lea.vmem %s3077_s0, %s2169_s19  ;;  %s2500_s25 = smov 127  }
  0x3d   : > { %v2646_v1 = vld [vmem:[%s331_s22 + $0x30] sm:$0xff]  ;;  %v2648_v2 = vld [vmem:[%s331_s22 + $0x38] sm:$0xff]  ;;  %v2650_v3 = vld [vmem:[%s331_s22 + $0x20] sm:$0xff]  ;;  %s2501_s26 = smov 113   ;;  %s2502_s10 = smov 112  }
  0x3e   : > { %v350_v4 = vadd.f32 %v2648_v2, %v2646_v1  ;;  %v2654_v5 = vld [vmem:[%s331_s22 + $0x28] sm:$0xff]  ;;  %v335_v6 = vld [vmem:[%s331_s22 + $0x10] sm:$0xff]  ;;  %v336_v7 = vld [vmem:[%s331_s22 + $0x18] sm:$0xff]  ;;  %s2503_s12 = smov 111   ;;  %p3098_p13 = scmp.ne.s32.totalorder %s3089_s15, 0 }
  0x3f   : > { %v344_v8 = vadd.f32 %v336_v7, %v335_v6  ;;  %v2656_v9 = vld [vmem:[%s331_s22] sm:$0xff]  ;;  %v2658_v10 = vld [vmem:[%s331_s22 + $0x8] sm:$0xff]  ;;  %v347_v11 = vadd.f32 %v2654_v5, %v2650_v3  ;;  %s2497_s22 = smov 17   ;;  %s2504_s19 = smov [#allocation7]  }
  0x40   : > { %351 = vadd.xlane.f32.xlu0 %v350_v4  ;;  %v341_v12 = vadd.f32 %v2658_v10, %v2656_v9  ;;  %s2423_s20 = sshll.u32 %s2504_s19, 4  ;;  %s2424_s20 = int_to_ptr.vmem [resolvable:$false] %s2423_s20 }
  0x41   : > { %345 = vadd.xlane.f32.xlu1 %v344_v8 }
  0x44   : > { %348 = vadd.xlane.f32.xlu0 %v347_v11 }
  0x45   : > { %342 = vadd.xlane.f32.xlu1 %v341_v12 }
  0xc9   : > { %v352_v13 = vpop.xlane.xlu0 %351 }
  0xca   : > { %2192 = vmatpush3.msra.mxu0 %v352_v13  ;;  %v346_v14 = vpop.xlane.xlu1 %345  ;;  %v781_v13 = vld [vmem:[%s3079_s2 + $0x8] sm:$0xff] }
  0xcb   : > { %2193 = vmatprep.subr.mxu0 %v2493_v0 }
  0xcd   : > { %v349_v15 = vpop.xlane.xlu0 %348 }
  0xce   : > { %2194 = vmatpush3.msra.mxu0 %v349_v15  ;;  %v343_v16 = vpop.xlane.xlu1 %342 }
  0xcf   : > { %2195 = vmatprep.subr.mxu0 %v2493_v0 }
  0xd0   : > { %2196 = vmatpush3.msra.mxu0 %v346_v14  ;;  %v780_v14 = vld [vmem:[%s3079_s2] sm:$0xff] }
  0xd1   : > { %2197 = vmatprep.subr.mxu0 %v2493_v0 }
  0xd2   : > { %2198 = vmatpush3.msra.mxu0 %v343_v16 }
  0xd3   : > { %2200 = vmatmul.mubr.msk.f32.vlgmr.msra.gmra.mxu0 %vm354_vm1, %v2668_v17  ;;  %2210 = vmatprep.subr.mxu0 %v2493_v0 }
  0xd4   : > { %2218 = vmatprep.mubr.msk.f32.mxu0 %vm2494_vm0, %v2493_v0 }
 0x193   : > { %v424_v20 = vpop.f32.mrf.mxu0 }
 0x194   : > { %v428_v21 = vmul.f32 0.00024414063, %v424_v20 }
 0x195   : > { %v2201_v22 = vpop.f32.mrf.mxu0 }
 0x196   : > { %2202 = vmatprep.subr.msk.mxu1 %vm446_vm3, %v428_v21 }
 0x197   : > { %2203 = vmatpush3.msk.msra.mxu1 %vm446_vm3, %v428_v21 }
 0x198   : > { %2205 = vmatmul.mubr.msk.f32.vlgmr.msra.gmra.mxu1 %vm433_vm2, %v2688_v23 }
 0x199   : > { %2207 = vmatprep.mubr.msk.f32.mxu1 %vm433_vm2, %v2694_v24 }
 0x19c   : > { %2208 = vmatmul.mubr.msk.f32.gmra.mxu1 %vm433_vm2, %v2704_v25 }
 0x19d   : > { %1019 = vmatprep.mubr.bf16.mxu1 %v2495_v19 }
 0x258   : > { %v2206_v26 = vpop.f32.mrf.mxu1 }
 0x259   : > { %542 = vperm.xlu1 %2304, %v2206_v26  }
 0x25a   : > { %v516_v27 = vpop.f32.mrf.mxu1 }
 0x25c   : > { %v2209_v28 = vpop.f32.mrf.mxu1 }
 0x25d   : > { %552 = vperm.xlu0 %2303, %v2209_v28  }
 0x25e   : > { %v526_v29 = vpop.f32.mrf.mxu1 }
 0x25f   : > { %547 = vperm.xlu1 %2304, %v526_v29  }
 0x263   : > { %537 = vperm.xlu1 %2304, %v516_v27  }
 0x2d4   : > { %v543_v30 = vpop.permute.xlu1 %542 }
 0x2d5   : > { %v2709_v31 = vsub.f32 %v335_v6, %v543_v30  ;;  %v2711_v33 = vsub.f32 %v336_v7, %v543_v30  ;;  %v745_v7 = vld [vmem:[%s3078_s1 + $0x8] sm:$0xff] }
 0x2d7   : > { %v565_v41 = vmul.f32 %v2709_v31, %v2709_v31  ;;  %v566_v45 = vmul.f32 %v2711_v33, %v2711_v33 }
 0x2d8   : > { %v553_v32 = vpop.permute.xlu0 %552 }
 0x2d9   : > { %v2714_v34 = vsub.f32 %v2646_v1, %v553_v32  ;;  %v2717_v35 = vsub.f32 %v2648_v2, %v553_v32  ;;  %v574_v50 = vadd.f32 %v566_v45, %v565_v41 }
 0x2da   : > { %v548_v36 = vpop.permute.xlu1 %547 }
 0x2db   : > { %v2720_v37 = vsub.f32 %v2650_v3, %v548_v36  ;;  %v2723_v38 = vsub.f32 %v2654_v5, %v548_v36  ;;  %v569_v39 = vmul.f32 %v2714_v34, %v2714_v34  ;;  %v570_v40 = vmul.f32 %v2717_v35, %v2717_v35  ;;  %v747_v3 = vld [vmem:[%s3078_s1 + $0x18] sm:$0xff]  ;;  %v746_v5 = vld [vmem:[%s3078_s1 + $0x10] sm:$0xff] }
 0x2dd   : > { %v580_v42 = vadd.f32 %v570_v40, %v569_v39  ;;  %v567_v43 = vmul.f32 %v2720_v37, %v2720_v37  ;;  %v568_v44 = vmul.f32 %v2723_v38, %v2723_v38 }
 0x2de   : > { %v538_v46 = vpop.permute.xlu1 %537 }
 0x2df   : > { %v2738_v47 = vsub.f32 %v2656_v9, %v538_v46  ;;  %v2741_v48 = vsub.f32 %v2658_v10, %v538_v46  ;;  %581 = vadd.xlane.f32.xlu1 %v580_v42  ;;  %v577_v49 = vadd.f32 %v568_v44, %v567_v43  ;;  %v744_v10 = vld [vmem:[%s3078_s1] sm:$0xff] }
 0x2e1   : > { %578 = vadd.xlane.f32.xlu0 %v577_v49  ;;  %v563_v51 = vmul.f32 %v2738_v47, %v2738_v47  ;;  %v564_v52 = vmul.f32 %v2741_v48, %v2741_v48 }
 0x2e3   : > { %575 = vadd.xlane.f32.xlu1 %v574_v50  ;;  %v571_v53 = vadd.f32 %v564_v52, %v563_v51 }
 0x2e7   : > { %572 = vadd.xlane.f32.xlu1 %v571_v53 }
 0x2f8   : > { %796 = vperm.xlu1 %2304, %v782_v54  }
 0x2fc   : > { %801 = vperm.xlu1 %2304, %v783_v55  }
 0x368   : > { %v582_v56 = vpop.xlane.xlu1 %581 }
 0x369   : > { %2211 = vmatpush3.msra.mxu0 %v582_v56 }
 0x36a   : > { %v579_v57 = vpop.xlane.xlu0 %578  ;;  %2212 = vmatprep.subr.mxu0 %v2493_v0 }
 0x36b   : > { %2213 = vmatpush3.msra.mxu0 %v579_v57 }
 0x36c   : > { %2214 = vmatprep.subr.mxu0 %v2493_v0  ;;  %v576_v58 = vpop.xlane.xlu1 %575 }
 0x36d   : > { %2215 = vmatpush3.msra.mxu0 %v576_v58 }
 0x36e   : > { %2216 = vmatprep.subr.mxu0 %v2493_v0 }
 0x370   : > { %v573_v59 = vpop.xlane.xlu1 %572 }
 0x371   : > { %2217 = vmatpush3.msra.mxu0 %v573_v59 }
 0x372   : > { %2219 = vmatmul.mubr.msk.f32.vlgmr.msra.gmra.mxu0 %vm354_vm1, %v2668_v17 }
 0x373   : > { %2223 = vmatprep.mubr.msk.f32.mxu0 %vm433_vm2, %v2679_v18 }
 0x374   : > { %v797_v15 = vpop.permute.xlu1 %796 }
 0x378   : > { %v802_v16 = vpop.permute.xlu1 %801 }
 0x432   : > { %v649_v60 = vpop.f32.mrf.mxu0 }
 0x433   : > { %v653_v61 = vmul.f32 0.00024414063, %v649_v60 }
 0x434   : > { %v2220_v62 = vpop.f32.mrf.mxu0 }
 0x435   : > { %v654_v63 = vadd.f32 1e-05, %v653_v61 }
 0x437   : > { %2333 = vrsqrt.f32 %v654_v63 }
 0x444   : > { %v2334_v1 = vpop.eup %2333 }
 0x445   : > { %2221 = vmatprep.subr.msk.mxu0 %vm446_vm3, %v2334_v1 }
 0x446   : > { %2222 = vmatpush3.msk.msra.mxu0 %vm446_vm3, %v2334_v1 }
 0x447   : > { %2224 = vmatmul.mubr.msk.f32.vlgmr.msra.gmra.mxu0 %vm433_vm2, %v2688_v23 }
 0x448   : > { %2226 = vmatprep.mubr.msk.f32.mxu0 %vm433_vm2, %v2694_v24 }
 0x44b   : > { %2227 = vmatmul.mubr.msk.f32.gmra.mxu0 %vm433_vm2, %v2704_v25 }
 0x44c   : > { %1088 = vmatprep.mubr.bf16.mxu0 %v2495_v19 }
 0x507   : > { %v2225_v0 = vpop.f32.mrf.mxu0 }
 0x508   : > { %v749_v11 = vmul.f32 %v2225_v0, %v745_v7 }
 0x509   : > { %v725_v2 = vpop.f32.mrf.mxu0 }
 0x50a   : > { %v748_v12 = vmul.f32 %v744_v10, %v725_v2 }
 0x50b   : > { %v2228_v4 = vpop.f32.mrf.mxu0 }
 0x50c   : > { %v751_v6 = vmul.f32 %v2228_v4, %v747_v3 }
 0x50d   : > { %v735_v8 = vpop.f32.mrf.mxu0 }
 0x50e   : > { %v750_v9 = vmul.f32 %v746_v5, %v735_v8  ;;  %769 = vperm.xlu0 %2303, %v751_v6  }
 0x510   : > { %764 = vperm.xlu1 %2304, %v750_v9  }
 0x512   : > { %759 = vperm.xlu0 %2303, %v749_v11  }
 0x514   : > { %754 = vperm.xlu1 %2304, %v748_v12  }
 0x516   : > { %791 = vperm.xlu0 %2303, %v781_v13  }
 0x518   : > { %786 = vperm.xlu1 %2304, %v780_v14  }
 0x589   : > { %v770_v17 = vpop.permute.xlu0 %769 }
 0x58a   : > { %v778_v18 = vmul.f32 %v770_v17, %v2714_v34  ;;  %v779_v20 = vmul.f32 %v770_v17, %v2717_v35 }
 0x58b   : > { %v765_v21 = vpop.permute.xlu1 %764 }
 0x58c   : > { %v810_v22 = vadd.f32 %v802_v16, %v778_v18  ;;  %v2789_v23 = vadd.f32 %v802_v16, %v779_v20  ;;  %v776_v24 = vmul.f32 %v765_v21, %v2720_v37  ;;  %v777_v25 = vmul.f32 %v765_v21, %v2723_v38  ;;  %v1950_v21 = vld [vmem:[%s3083_s6 + $0x8] sm:$0xff] }
 0x58d   : > { %v760_v26 = vpop.permute.xlu0 %759 }
 0x58e   : > { %v2116_v27 = vmul.f32 -1.442695, %v810_v22  ;;  %v2117_v28 = vmul.f32 -1.442695, %v2789_v23  ;;  %v808_v29 = vadd.f32 %v797_v15, %v776_v24  ;;  %v809_v30 = vadd.f32 %v797_v15, %v777_v25  ;;  %v1951_v24 = vld [vmem:[%s3083_s6 + $0x10] sm:$0xff] }
 0x58f   : > { %v774_v32 = vmul.f32 %v760_v26, %v2709_v31  ;;  %v755_v36 = vpop.permute.xlu1 %754  ;;  %v775_v39 = vmul.f32 %v760_v26, %v2711_v33  ;;  %v898_v25 = vld [vmem:[%s3084_s7] sm:$0x11] }
 0x590   : > { %2335 = vpow2.f32 %v2116_v27  ;;  %v2114_v34 = vmul.f32 -1.442695, %v808_v29  ;;  %v2115_v35 = vmul.f32 -1.442695, %v809_v30  ;;  %v772_v40 = vmul.f32 %v755_v36, %v2738_v47 }
 0x591   : > { %2337 = vpow2.f32 %v2117_v28  ;;  %v792_v37 = vpop.permute.xlu0 %791  ;;  %v773_v38 = vmul.f32 %v755_v36, %v2741_v48  ;;  %v2118_v26 = vcombine.low %v898_v25, %v898_v25  ;;  %v2119_v27 = vcombine.high %v898_v25, %v898_v25 }
 0x592   : > { %2339 = vpow2.f32 %v2114_v34  ;;  %v806_v41 = vadd.f32 %v792_v37, %v774_v32  ;;  %v807_v42 = vadd.f32 %v792_v37, %v775_v39  ;;  %v907_v28 = vlaneseq }
 0x593   : > { %2341 = vpow2.f32 %v2115_v35  ;;  %v787_v43 = vpop.permute.xlu1 %786  ;;  %v955_v32 = vshrl.u32 %v2119_v27, 16 }
 0x594   : > { %v2112_v44 = vmul.f32 -1.442695, %v806_v41  ;;  %v2113_v45 = vmul.f32 -1.442695, %v807_v42  ;;  %v804_v31 = vadd.f32 %v787_v43, %v772_v40  ;;  %v805_v46 = vadd.f32 %v787_v43, %v773_v38 }
 0x595   : > { %v956_v35 = vpack.i.b16 %v955_v32, %v955_v32 }
 0x596   : > { %2343 = vpow2.f32 %v2112_v44  ;;  %v2110_v49 = vmul.f32 -1.442695, %v804_v31  ;;  %v2111_v50 = vmul.f32 -1.442695, %v805_v46 }
 0x597   : > { %2345 = vpow2.f32 %v2113_v45  ;;  %v1131_v45 = vld [vmem:[%s3084_s7] sm:$0x22] }
 0x598   : > { %2347 = vpow2.f32 %v2110_v49  ;;  %v2128_v49 = vcombine.low %v1131_v45, %v1131_v45 }
 0x599   : > { %2349 = vpow2.f32 %v2111_v50 }
 0x59d   : > { %v2336_v33 = vpop.eup %2335 }
 0x59e   : > { %v2338_v47 = vpop.eup %2337  ;;  %v842_v51 = vadd.f32 1.0, %v2336_v33 }
 0x59f   : > { %v2340_v52 = vpop.eup %2339  ;;  %v843_v53 = vadd.f32 1.0, %v2338_v47  ;;  %v2129_v47 = vcombine.high %v1131_v45, %v1131_v45 }
 0x5a0   : > { %v2342_v48 = vpop.eup %2341  ;;  %2351 = vrcp.f32 %v842_v51  ;;  %v840_v54 = vadd.f32 1.0, %v2340_v52 }
 0x5a1   : > { %2353 = vrcp.f32 %v843_v53  ;;  %v841_v55 = vadd.f32 1.0, %v2342_v48  ;;  %v905_v48 = vpack.i.b16 %v2118_v26, %v2118_v26 }
 0x5a2   : > { %2355 = vrcp.f32 %v840_v54  ;;  %v912_v54 = vpack.i.b16 %v2119_v27, %v2119_v27 }
 0x5a3   : > { %v2344_v56 = vpop.eup %2343  ;;  %2357 = vrcp.f32 %v841_v55 }
 0x5a4   : > { %v2346_v57 = vpop.eup %2345  ;;  %v838_v58 = vadd.f32 1.0, %v2344_v56  ;;  %v2307_v56 = vld [vmem:[#allocation5 + $0x10] sm:$0xff]  }
 0x5a5   : > { %v2348_v59 = vpop.eup %2347  ;;  %v839_v60 = vadd.f32 1.0, %v2346_v57  ;;  %v1138_v57 = vpack.i.b16 %v2128_v49, %v2128_v49 }
 0x5a6   : > { %v2350_v61 = vpop.eup %2349  ;;  %2359 = vrcp.f32 %v838_v58  ;;  %v836_v62 = vadd.f32 1.0, %v2348_v59  ;;  %v1145_v59 = vpack.i.b16 %v2129_v47, %v2129_v47 }
 0x5a7   : > { %2361 = vrcp.f32 %v839_v60  ;;  %v837_v63 = vadd.f32 1.0, %v2350_v61 }
 0x5a8   : > { %2363 = vrcp.f32 %v836_v62 }
 0x5a9   : > { %2365 = vrcp.f32 %v837_v63 }
 0x5ad   : > { %v2352_v1 = vpop.eup %2351 }
 0x5ae   : > { %v2354_v0 = vpop.eup %2353  ;;  %v866_v4 = vmul.f32 %v2352_v1, %v810_v22  ;;  %v1949_v22 = vld [vmem:[%s3083_s6] sm:$0xff] }
 0x5af   : > { %v2356_v2 = vpop.eup %2355  ;;  %v867_v6 = vmul.f32 %v2354_v0, %v2789_v23  ;;  %v1952_v23 = vld [vmem:[%s3083_s6 + $0x18] sm:$0xff] }
 0x5b0   : > { %v2358_v3 = vpop.eup %2357  ;;  %v864_v5 = vmul.f32 %v2356_v2, %v808_v29  ;;  %v2858_v29 = vshrl.u32 %v907_v28, 7  ;;  %v2311_v28 = vld [vmem:[#allocation5] sm:$0xff]  }
 0x5b1   : > { %v865_v7 = vmul.f32 %v2358_v3, %v809_v30  ;;  %v948_v30 = vshrl.u32 %v2118_v26, 16 }
 0x5b2   : > { %v2799_v8 = vpack.c.bf16 %v866_v4, %v864_v5  ;;  %v2861_v36 = vsub.s32 0, %v2858_v29  ;;  %v1142_v58 = vsub.s32 1, %v2858_v29 }
 0x5b3   : > { %v2360_v9 = vpop.eup %2359  ;;  %v2801_v10 = vpack.c.bf16 %v867_v6, %v865_v7  ;;  %v949_v34 = vpack.i.b16 %v948_v30, %v948_v30  ;;  %v1259_v7 = vshrl.u32 %v2128_v49, 16 }
 0x5b4   : > { %v2362_v11 = vpop.eup %2361  ;;  %932 = vrot.lane.b32.xlu0 %v2799_v8, %s2496_s21  ;;  %v862_v14 = vmul.f32 %v2360_v9, %v806_v41  ;;  %v961_v40 = vrot.slane %v956_v35, %v2861_v36  ;;  %v910_v61 = vrot.slane %v905_v48, %v2861_v36  ;;  %v917_v62 = vrot.slane %v912_v54, %v2861_v36 }
 0x5b5   : > { %v2364_v12 = vpop.eup %2363  ;;  %928 = vrot.lane.b32.xlu1 %v2801_v10, %s2496_s21  ;;  %v863_v16 = vmul.f32 %v2362_v11, %v807_v42  ;;  %v954_v39 = vrot.slane %v949_v34, %v2861_v36  ;;  %v1143_v1 = vrot.slane %v1138_v57, %v1142_v58  ;;  %v1150_v4 = vrot.slane %v1145_v59, %v1142_v58  ;;  %v1463_v34 = vld [vmem:[%s3084_s7] sm:$0x44] }
 0x5b6   : > { %v2366_v13 = vpop.eup %2365  ;;  %v860_v15 = vmul.f32 %v2364_v12, %v804_v31  ;;  %v1266_v9 = vshrl.u32 %v2129_v47, 16 }
 0x5b7   : > { %v861_v17 = vmul.f32 %v2366_v13, %v805_v46 }
 0x5b8   : > { %v2807_v18 = vpack.c.bf16 %v862_v14, %v860_v15  ;;  %v2310_v15 = vld [vmem:[#allocation5 + $0x18] sm:$0xff]  }
 0x5b9   : > { %v2809_v20 = vpack.c.bf16 %v863_v16, %v861_v17 }
 0x5ba   : > { %930 = vrot.lane.b32.xlu0 %v2807_v18, %s2496_s21 }
 0x5bb   : > { %926 = vrot.lane.b32.xlu1 %v2809_v20, %s2496_s21 }
 0x5be   : > { %880 = vrot.lane.b32.xlu0 %v2807_v18, %s2497_s22 }
 0x5bf   : > { %874 = vrot.lane.b32.xlu1 %v2809_v20, %s2497_s22 }
 0x5c2   : > { %882 = vrot.lane.b32.xlu0 %v2799_v8, %s2497_s22 }
 0x5c3   : > { %876 = vrot.lane.b32.xlu1 %v2801_v10, %s2497_s22  ;;  %s2425_s22 = scalar_lea.vmem %s2424_s20, 2048 }
 0x5c6   : > { %1115 = vrot.lane.b32.xlu0 %v2799_v8, %s2498_s23 }
 0x5c7   : > { %1111 = vrot.lane.b32.xlu1 %v2801_v10, %s2498_s23 }
 0x5ca   : > { %1113 = vrot.lane.b32.xlu0 %v2807_v18, %s2498_s23 }
 0x5cb   : > { %1109 = vrot.lane.b32.xlu1 %v2809_v20, %s2498_s23  ;;  %s324_s23 = sand.u32 1, %s2479_s28  }
 0x5cc   : > { %s3036_s17 = scalar_lea.sflag [#allocation4], %s324_s23 }
 0x5ce   : > { %1243 = vrot.lane.b32.xlu0 %v2799_v8, %s2499_s24 }
 0x5cf   : > { %1239 = vrot.lane.b32.xlu1 %v2801_v10, %s2499_s24 }
 0x5d2   : > { %1241 = vrot.lane.b32.xlu0 %v2807_v18, %s2499_s24 }
 0x5d3   : > { %1237 = vrot.lane.b32.xlu1 %v2809_v20, %s2499_s24  ;;  %s2095_s24 = sshll.u32 %s324_s23, 6 }
 0x5d6   : > { %1443 = vrot.lane.b32.xlu0 %v2809_v20, %s2500_s25 }
 0x5d7   : > { %1441 = vrot.lane.b32.xlu1 %v2807_v18, %s2500_s25 }
 0x5da   : > { %1447 = vrot.lane.b32.xlu0 %v2801_v10, %s2500_s25 }
 0x5db   : > { %1445 = vrot.lane.b32.xlu1 %v2799_v8, %s2500_s25  ;;  %s3011_s25 = scalar_lea.vmem [#allocation7], %s2095_s24 }
 0x5de   : > { %1577 = vrot.lane.b32.xlu0 %v2801_v10, %s2501_s26 }
 0x5df   : > { %1575 = vrot.lane.b32.xlu1 %v2799_v8, %s2501_s26 }
 0x5e2   : > { %1573 = vrot.lane.b32.xlu0 %v2809_v20, %s2501_s26 }
 0x5e3   : > { %1571 = vrot.lane.b32.xlu1 %v2807_v18, %s2501_s26  ;;  %s2003_s26 = sshll.u32 %s3011_s25, 4  ;;  %s3025_s26 = int_to_ptr.vmem [resolvable:$true] %s2003_s26 }
 0x5e4   : > { %p2426_p8 = scmp.lt.s32.totalorder %s3025_s26, %s2424_s20 }
 0x5e6   : > { %1701 = vrot.lane.b32.xlu0 %v2809_v20, %s2502_s10 }
 0x5e7   : > { %1699 = vrot.lane.b32.xlu1 %v2807_v18, %s2502_s10 }
 0x5ea   : > { %1705 = vrot.lane.b32.xlu0 %v2801_v10, %s2502_s10 }
 0x5eb   : > { %1703 = vrot.lane.b32.xlu1 %v2799_v8, %s2502_s10  ;;  %s2170_s10 = sshll.u32 %s2572_s9, 10  ;;  %s2419_s9 = scalar_lea.vmem %s3025_s26, 1024 }
 0x5ec   : > { %s3031_s18 = scalar_lea.hbm %s3085_s8, %s2170_s10  ;;  %p2420_p12 = scmp.ne.s32.totalorder %s3025_s26, %s2419_s9 }
 0x5ed   : > { %p2427_p11 = scmp.lt.s32.totalorder %s2425_s22, %s2419_s9 }
 0x5ee   : > { %1827 = vrot.lane.b32.xlu0 %v2801_v10, %s2503_s12  ;;  %p2421_p4 = pnand %p2420_p12, %p3098_p13 }
 0x5ef   : > { %1825 = vrot.lane.b32.xlu1 %v2799_v8, %s2503_s12  ;;  %p2428_p0 = por %p2427_p11, %p2426_p8 }
 0x5f0   : > { %p2422_p7 = pneg %p2421_p4 }
 0x5f2   : > { %1823 = vrot.lane.b32.xlu0 %v2809_v20, %s2503_s12  ;;  %p2429_p1 = pnand %p2428_p0, %p2422_p7 }
 0x5f3   : > { %1821 = vrot.lane.b32.xlu1 %v2807_v18, %s2503_s12 }
 0x5f6   : > { %1960 = vperm.xlu0 %2303, %v1950_v21  }
 0x5f7   : > { %1955 = vperm.xlu1 %2304, %v1949_v22  }
 0x5fa   : > { %1970 = vperm.xlu0 %2303, %v1952_v23   ;;  %v1260_v23 = vpack.i.b16 %v1259_v7, %v1259_v7 }
 0x5fb   : > { %1965 = vperm.xlu1 %2304, %v1951_v24   ;;  %v1267_v24 = vpack.i.b16 %v1266_v9, %v1266_v9 }
 0x626   : > { %v933_v37 = vpop.permute.xlu0 %932 }
 0x627   : > { %v929_v38 = vpop.permute.xlu1 %928 }
 0x628   : > { %v936_v41 = vsel %vm934_vm4, %v933_v37, %v929_v38  ;;  %v946_v42 = vsel %vm934_vm4, %v929_v38, %v933_v37  ;;  %v1272_v37 = vrot.slane %v1267_v24, %v1142_v58 }
 0x629   : > { %v964_v43 = vmul.bf16 %v954_v39, %v946_v42  ;;  %v965_v44 = vmul.bf16 %v961_v40, %v936_v41  ;;  %v2312_v42 = vld [vmem:[#allocation5 + $0x20] sm:$0xff]  }
 0x62b   : > { %999 = vmatprep.subr.bf16.mxu1 %v965_v44  ;;  %v2143_v44 = vcombine.high %v1463_v34, %v1463_v34 }
 0x62c   : > { %1000 = vmatpush1.bf16.msra.mxu1 %v964_v43  ;;  %v931_v31 = vpop.permute.xlu0 %930  ;;  %v2142_v43 = vcombine.low %v1463_v34, %v1463_v34 }
 0x62d   : > { %v927_v46 = vpop.permute.xlu1 %926 }
 0x62e   : > { %v935_v50 = vsel %vm934_vm4, %v931_v31, %v927_v46  ;;  %v942_v33 = vsel %vm934_vm4, %v927_v46, %v931_v31 }
 0x62f   : > { %v962_v51 = vmul.bf16 %v954_v39, %v942_v33  ;;  %v963_v52 = vmul.bf16 %v961_v40, %v935_v50  ;;  %v1265_v40 = vrot.slane %v1260_v23, %v1142_v58  ;;  %v1593_v50 = vld [vmem:[%s3084_s7] sm:$0x88] }
 0x630   : > { %v881_v53 = vpop.permute.xlu0 %880  ;;  %v2906_v57 = vcombine.high %v1593_v50, %v1593_v50 }
 0x631   : > { %1001 = vmatprep.subr.bf16.mxu1 %v963_v52  ;;  %v875_v55 = vpop.permute.xlu1 %874  ;;  %v1470_v52 = vshrl.u32 %v2142_v43, 16 }
 0x632   : > { %1002 = vmatpush1.bf16.msra.mxu1 %v962_v51  ;;  %v885_v0 = vsel %vm884_vm5, %v881_v53, %v875_v55  ;;  %v892_v12 = vsel %vm884_vm5, %v875_v55, %v881_v53  ;;  %v2313_v51 = vld [vmem:[#allocation5 + $0x8] sm:$0xff]   ;;  %v1478_v53 = vshrl.u32 %v2143_v44, 16  ;;  %v1728_v34 = vshrl.u32 %v2906_v57, 16 }
 0x633   : > { %v919_v13 = vmul.bf16 %v917_v62, %v885_v0  ;;  %v918_v25 = vmul.bf16 %v910_v61, %v892_v12  ;;  %v1471_v59 = vpack.i.b16 %v1470_v52, %v1470_v52  ;;  %v2323_v52 = vld [vmem:[#allocation5 + $0x50] sm:$0xff]  }
 0x634   : > { %v883_v60 = vpop.permute.xlu0 %882  ;;  %v1729_v44 = vpack.i.b16 %v1728_v34, %v1728_v34 }
 0x635   : > { %2122 = vmatmul.mubr.msk.bf16.vlgmr.msra.gmra.mxu1 %vm354_vm1, %v2307_v56  ;;  %v877_v63 = vpop.permute.xlu1 %876 }
 0x636   : > { %v886_v2 = vsel %vm884_vm5, %v883_v60, %v877_v63  ;;  %v896_v3 = vsel %vm884_vm5, %v877_v63, %v883_v60  ;;  %1029 = vmatprep.mubr.bf16.mxu1 %v2495_v19  ;;  %v1475_v60 = vsub.s32 2, %v2858_v29  ;;  %v2915_v63 = vsub.s32 3, %v2858_v29 }
 0x637   : > { %v920_v5 = vmul.bf16 %v910_v61, %v896_v3  ;;  %v921_v6 = vmul.bf16 %v917_v62, %v886_v2  ;;  %v1479_v61 = vpack.i.b16 %v1478_v53, %v1478_v53 }
 0x638   : > { %v1116_v11 = vpop.permute.xlu0 %1115  ;;  %v1476_v2 = vrot.slane %v1471_v59, %v1475_v60 }
 0x639   : > { %1068 = vmatprep.subr.bf16.mxu0 %v921_v6  ;;  %v1112_v14 = vpop.permute.xlu1 %1111  ;;  %v1484_v3 = vrot.slane %v1479_v61, %v1475_v60 }
 0x63a   : > { %v1119_v16 = vsel %vm1117_vm6, %v1116_v11, %v1112_v14  ;;  %v1129_v17 = vsel %vm1117_vm6, %v1112_v14, %v1116_v11  ;;  %1069 = vmatpush1.bf16.msra.mxu0 %v920_v5  ;;  %v2317_v5 = vld [vmem:[#allocation5 + $0x30] sm:$0xff]  }
 0x63b   : > { %v1153_v21 = vmul.bf16 %v1143_v1, %v1129_v17  ;;  %v1154_v22 = vmul.bf16 %v1150_v4, %v1119_v16  ;;  %1070 = vmatprep.subr.bf16.mxu0 %v919_v13  ;;  %v2320_v17 = vld [vmem:[#allocation5 + $0x40] sm:$0xff]  }
 0x63c   : > { %v1114_v26 = vpop.permute.xlu0 %1113 }
 0x63d   : > { %2123 = vmatmul.mubr.msk.bf16.gmra.mxu1 %vm354_vm1, %v2310_v15  ;;  %1188 = vmatprep.subr.bf16.mxu1 %v1154_v22  ;;  %v1110_v27 = vpop.permute.xlu1 %1109 }
 0x63e   : > { %v1118_v30 = vsel %vm1117_vm6, %v1114_v26, %v1110_v27  ;;  %v1125_v32 = vsel %vm1117_vm6, %v1110_v27, %v1114_v26  ;;  %1071 = vmatpush1.bf16.msra.mxu0 %v918_v25  ;;  %1189 = vmatpush1.bf16.msra.mxu1 %v1153_v21  ;;  %v1843_v27 = vld [vmem:[%s3084_s7 + $0x8] sm:$0x11] }
 0x63f   : > { %v1151_v35 = vmul.bf16 %v1143_v1, %v1125_v32  ;;  %v1152_v39 = vmul.bf16 %v1150_v4, %v1118_v30  ;;  %1208 = vmatprep.mubr.bf16.mxu1 %v2495_v19  ;;  %v1607_v1 = vpack.i.b16 %v2906_v57, %v2906_v57  ;;  %v2321_v30 = vld [vmem:[#allocation5 + $0x38] sm:$0xff]  }
 0x640   : > { %v1244_v38 = vpop.permute.xlu0 %1243 }
 0x641   : > { %2126 = vmatmul.mubr.msk.bf16.vlgmr.msra.gmra.mxu0 %vm354_vm1, %v2311_v28  ;;  %1190 = vmatprep.subr.bf16.mxu1 %v1152_v39  ;;  %v1240_v41 = vpop.permute.xlu1 %1239  ;;  %v1612_v12 = vrot.slane %v1607_v1, %v2915_v63 }
 0x642   : > { %v1247_v45 = vsel %vm1245_vm7, %v1244_v38, %v1240_v41  ;;  %v1257_v31 = vsel %vm1245_vm7, %v1240_v41, %v1244_v38  ;;  %1191 = vmatpush1.bf16.msra.mxu1 %v1151_v35  ;;  %1098 = vmatprep.mubr.bf16.mxu0 %v2495_v19  ;;  %v2158_v38 = vcombine.low %v1843_v27, %v1843_v27 }
 0x643   : > { %v1275_v46 = vmul.bf16 %v1265_v40, %v1257_v31  ;;  %v1276_v49 = vmul.bf16 %v1272_v37, %v1247_v45  ;;  %1392 = vmatprep.subr.bf16.mxu1 %v2801_v10  ;;  %v2902_v10 = vcombine.low %v1593_v50, %v1593_v50  ;;  %v2159_v41 = vcombine.high %v1843_v27, %v1843_v27  ;;  %v2322_v31 = vld [vmem:[#allocation5 + $0x48] sm:$0xff]  }
 0x644   : > { %v1242_v33 = vpop.permute.xlu0 %1241 }
 0x645   : > { %2132 = vmatmul.mubr.msk.bf16.vlgmr.msra.gmra.mxu1 %vm354_vm1, %v2312_v42  ;;  %1310 = vmatprep.subr.bf16.mxu0 %v1276_v49  ;;  %v1238_v47 = vpop.permute.xlu1 %1237  ;;  %v1721_v32 = vshrl.u32 %v2902_v10, 16  ;;  %v1857_v49 = vpack.i.b16 %v2159_v41, %v2159_v41 }
 0x646   : > { %v1246_v48 = vsel %vm1245_vm7, %v1242_v33, %v1238_v47  ;;  %v1253_v54 = vsel %vm1245_vm7, %v1238_v47, %v1242_v33  ;;  %1311 = vmatpush1.bf16.msra.mxu0 %v1275_v46  ;;  %1393 = vmatpush1.bf16.msra.mxu1 %v2799_v8  ;;  %v2316_v8 = vld [vmem:[#allocation5 + $0x28] sm:$0xff]   ;;  %v1850_v46 = vpack.i.b16 %v2158_v38, %v2158_v38 }
 0x647   : > { %v1273_v55 = vmul.bf16 %v1265_v40, %v1253_v54  ;;  %v1274_v56 = vmul.bf16 %v1272_v37, %v1246_v48  ;;  %1394 = vmatprep.subr.bf16.mxu1 %v2809_v20  ;;  %1218 = vmatprep.mubr.bf16.mxu1 %v2495_v19  ;;  %v1600_v20 = vpack.i.b16 %v2902_v10, %v2902_v10 }
 0x648   : > { %v1444_v58 = vpop.permute.xlu0 %1443  ;;  %v1722_v43 = vpack.i.b16 %v1721_v32, %v1721_v32  ;;  %v1734_v47 = vrot.slane %v1729_v44, %v2915_v63  ;;  %v1862_v57 = vrot.slane %v1857_v49, %v2861_v36 }
 0x649   : > { %2127 = vmatmul.mubr.msk.bf16.gmra.mxu0 %vm354_vm1, %v2313_v51  ;;  %1312 = vmatprep.subr.bf16.mxu0 %v1274_v56  ;;  %v1442_v62 = vpop.permute.xlu1 %1441  ;;  %v1605_v11 = vrot.slane %v1600_v20, %v2915_v63  ;;  %v1855_v56 = vrot.slane %v1850_v46, %v2861_v36 }
 0x64a   : > { %1313 = vmatpush1.bf16.msra.mxu0 %v1273_v55  ;;  %1395 = vmatpush1.bf16.msra.mxu1 %v2807_v18  ;;  %v1457_v18 = vsel %vm1449_vm8, %v1444_v58, %v1442_v62  ;;  %v1450_v14 = vsel %vm1449_vm8, %v1442_v62, %v1444_v58  ;;  %v1727_v33 = vrot.slane %v1722_v43, %v2915_v63  ;;  %v2326_v62 = vld [vmem:[#allocation5 + $0x60] sm:$0xff]  }
 0x64b   : > { %1330 = vmatprep.mubr.bf16.mxu0 %v2495_v19  ;;  %v1486_v15 = vmul.bf16 %v1484_v3, %v1457_v18  ;;  %v1485_v25 = vmul.bf16 %v1476_v2, %v1450_v14 }
 0x64c   : > { %v1448_v0 = vpop.permute.xlu0 %1447 }
 0x64d   : > { %2133 = vmatmul.mubr.msk.bf16.gmra.mxu1 %vm354_vm1, %v2316_v8  ;;  %v1446_v4 = vpop.permute.xlu1 %1445 }
 0x64e   : > { %v1451_v6 = vsel %vm1449_vm8, %v1446_v4, %v1448_v0  ;;  %v1461_v7 = vsel %vm1449_vm8, %v1448_v0, %v1446_v4  ;;  %1412 = vmatprep.mubr.bf16.mxu1 %v2495_v19 }
 0x64f   : > { %v1487_v29 = vmul.bf16 %v1476_v2, %v1451_v6  ;;  %v1488_v9 = vmul.bf16 %v1484_v3, %v1461_v7  ;;  %v2327_v3 = vld [vmem:[#allocation5 + $0x58] sm:$0xff]   ;;  %v2328_v7 = vld [vmem:[#allocation5 + $0x68] sm:$0xff]  }
 0x650   : > { %v1578_v13 = vpop.permute.xlu0 %1577 }
 0x651   : > { %2136 = vmatmul.mubr.msk.bf16.vlgmr.msra.gmra.mxu0 %vm354_vm1, %v2317_v5  ;;  %1522 = vmatprep.subr.bf16.mxu0 %v1488_v9  ;;  %v1576_v16 = vpop.permute.xlu1 %1575  ;;  %v2330_v9 = vld [vmem:[#allocation5 + $0x80] sm:$0xff]  }
 0x652   : > { %v1581_v21 = vsel %vm1579_vm9, %v1576_v16, %v1578_v13  ;;  %v1591_v22 = vsel %vm1579_vm9, %v1578_v13, %v1576_v16  ;;  %1523 = vmatpush1.bf16.msra.mxu0 %v1487_v29  ;;  %1340 = vmatprep.mubr.bf16.mxu0 %v2495_v19  ;;  %v2329_v29 = vld [vmem:[#allocation5 + $0x70] sm:$0xff]  }
 0x653   : > { %v1615_v23 = vmul.bf16 %v1605_v11, %v1581_v21  ;;  %v1616_v24 = vmul.bf16 %v1612_v12, %v1591_v22  ;;  %1524 = vmatprep.subr.bf16.mxu0 %v1486_v15 }
 0x654   : > { %v1574_v26 = vpop.permute.xlu0 %1573 }
 0x655   : > { %2140 = vmatmul.mubr.msk.bf16.vlgmr.msra.gmra.mxu1 %vm354_vm1, %v2320_v17  ;;  %1650 = vmatprep.subr.bf16.mxu1 %v1616_v24  ;;  %v1572_v28 = vpop.permute.xlu1 %1571 }
 0x656   : > { %v1580_v35 = vsel %vm1579_vm9, %v1572_v28, %v1574_v26  ;;  %v1587_v39 = vsel %vm1579_vm9, %v1574_v26, %v1572_v28  ;;  %1525 = vmatpush1.bf16.msra.mxu0 %v1485_v25  ;;  %1651 = vmatpush1.bf16.msra.mxu1 %v1615_v23 }
 0x657   : > { %v1613_v40 = vmul.bf16 %v1605_v11, %v1580_v35  ;;  %v1614_v37 = vmul.bf16 %v1612_v12, %v1587_v39  ;;  %1422 = vmatprep.mubr.bf16.mxu1 %v2495_v19  ;;  %v2331_v11 = vld [vmem:[#allocation5 + $0x78] sm:$0xff]   ;;  %v2332_v12 = vld [vmem:[#allocation5 + $0x88] sm:$0xff]  }
 0x658   : > { %v1702_v42 = vpop.permute.xlu0 %1701 }
 0x659   : > { %2137 = vmatmul.mubr.msk.bf16.gmra.mxu0 %vm354_vm1, %v2321_v30  ;;  %1652 = vmatprep.subr.bf16.mxu1 %v1614_v37  ;;  %v1700_v45 = vpop.permute.xlu1 %1699 }
 0x65a   : > { %1653 = vmatpush1.bf16.msra.mxu1 %v1613_v40  ;;  %1542 = vmatprep.mubr.bf16.mxu0 %v2495_v19  ;;  %v1715_v53 = vsel %vm1707_vm10, %v1702_v42, %v1700_v45  ;;  %v1708_v59 = vsel %vm1707_vm10, %v1700_v45, %v1702_v42 }
 0x65b   : > { %v1736_v60 = vmul.bf16 %v1734_v47, %v1715_v53  ;;  %v1735_v36 = vmul.bf16 %v1727_v33, %v1708_v59 }
 0x65c   : > { %v1706_v50 = vpop.permute.xlu0 %1705 }
 0x65d   : > { %2141 = vmatmul.mubr.msk.bf16.gmra.mxu1 %vm354_vm1, %v2322_v31  ;;  %v1704_v51 = vpop.permute.xlu1 %1703 }
 0x65e   : > { %v1709_v48 = vsel %vm1707_vm10, %v1704_v51, %v1706_v50  ;;  %v1719_v54 = vsel %vm1707_vm10, %v1706_v50, %v1704_v51  ;;  %1670 = vmatprep.mubr.bf16.mxu1 %v2495_v19 }
 0x65f   : > { %v1737_v10 = vmul.bf16 %v1727_v33, %v1709_v48  ;;  %v1738_v55 = vmul.bf16 %v1734_v47, %v1719_v54 }
 0x660   : > { %v1828_v58 = vpop.permute.xlu0 %1827 }
 0x661   : > { %2146 = vmatmul.mubr.msk.bf16.vlgmr.msra.gmra.mxu0 %vm354_vm1, %v2323_v52  ;;  %1772 = vmatprep.subr.bf16.mxu0 %v1738_v55  ;;  %v1826_v61 = vpop.permute.xlu1 %1825 }
 0x662   : > { %v1831_v8 = vsel %vm1829_vm11, %v1826_v61, %v1828_v58  ;;  %v1841_v20 = vsel %vm1829_vm11, %v1828_v58, %v1826_v61  ;;  %1773 = vmatpush1.bf16.msra.mxu0 %v1737_v10  ;;  %1552 = vmatprep.mubr.bf16.mxu0 %v2495_v19 }
 0x663   : > { %v1865_v63 = vmul.bf16 %v1855_v56, %v1831_v8  ;;  %v1866_v1 = vmul.bf16 %v1862_v57, %v1841_v20  ;;  %1774 = vmatprep.subr.bf16.mxu0 %v1736_v60 }
 0x664   : > { %v1824_v0 = vpop.permute.xlu0 %1823 }
 0x665   : > { %2152 = vmatmul.mubr.msk.bf16.vlgmr.msra.gmra.mxu1 %vm354_vm1, %v2326_v62  ;;  %1900 = vmatprep.subr.bf16.mxu1 %v1866_v1  ;;  %v1822_v2 = vpop.permute.xlu1 %1821 }
 0x666   : > { %v1830_v4 = vsel %vm1829_vm11, %v1822_v2, %v1824_v0  ;;  %v1837_v5 = vsel %vm1829_vm11, %v1824_v0, %v1822_v2  ;;  %1775 = vmatpush1.bf16.msra.mxu0 %v1735_v36  ;;  %1901 = vmatpush1.bf16.msra.mxu1 %v1865_v63 }
 0x667   : > { %v1863_v18 = vmul.bf16 %v1855_v56, %v1830_v4  ;;  %v1864_v6 = vmul.bf16 %v1862_v57, %v1837_v5  ;;  %1680 = vmatprep.mubr.bf16.mxu1 %v2495_v19 }
 0x669   : > { %2147 = vmatmul.mubr.msk.bf16.gmra.mxu0 %vm354_vm1, %v2327_v3  ;;  %1902 = vmatprep.subr.bf16.mxu1 %v1864_v6 }
 0x66a   : > { %1903 = vmatpush1.bf16.msra.mxu1 %v1863_v18  ;;  %1792 = vmatprep.mubr.bf16.mxu0 %v2495_v19 }
 0x66d   : > { %2153 = vmatmul.mubr.msk.bf16.gmra.mxu1 %vm354_vm1, %v2328_v7 }
 0x66e   : > { %1920 = vmatprep.mubr.bf16.mxu1 %v2495_v19 }
 0x671   : > { %2156 = vmatmul.mubr.msk.bf16.vlgmr.msra.gmra.mxu0 %vm354_vm1, %v2329_v29 }
 0x672   : > { %1802 = vmatprep.mubr.bf16.mxu0 %v2495_v19 }
 0x675   : > { %2162 = vmatmul.mubr.msk.bf16.vlgmr.msra.gmra.mxu1 %vm354_vm1, %v2330_v9 }
 0x676   : > { %1930 = vmatprep.mubr.bf16.mxu1 %v2495_v19 }
 0x679   : > { %2157 = vmatmul.mubr.msk.bf16.gmra.mxu0 %vm354_vm1, %v2331_v11 }
 0x67d   : > { %2163 = vmatmul.mubr.msk.bf16.gmra.mxu1 %vm354_vm1, %v2332_v12 }
 0x6f5   : > { %v1021_v13 = vpop.f32.mrf.mxu1 }
 0x6f7   : > { %v1023_v14 = vpop.f32.mrf.mxu1 }
 0x6f9   : > { %v1025_v15 = vpop.f32.mrf.mxu1 }
 0x6fb   : > { %v1027_v16 = vpop.f32.mrf.mxu1 }
 0x6fd   : > { %v1031_v17 = vpop.f32.mrf.mxu1 }
 0x6ff   : > { %v2970_v21 = vpop.f32.mrf.mxu1 }
 0x701   : > { %v2972_v22 = vpop.f32.mrf.mxu1  ;;  %v1090_v23 = vpop.f32.mrf.mxu0 }
 0x702   : > { %v1091_v62 = vadd.f32 %v1090_v23, %v1021_v13 }
 0x703   : > { %v2974_v24 = vpop.f32.mrf.mxu1  ;;  %v1092_v25 = vpop.f32.mrf.mxu0 }
 0x704   : > { %v1093_v63 = vadd.f32 %v1092_v25, %v1023_v14 }
 0x705   : > { %v1094_v26 = vpop.f32.mrf.mxu0  ;;  %v1210_v19 = vpop.f32.mrf.mxu1 }
 0x706   : > { %v1229_v1 = vadd.f32 %v1210_v19, %v1091_v62  ;;  %v1095_v2 = vadd.f32 %v1094_v26, %v1025_v15 }
 0x707   : > { %v1096_v27 = vpop.f32.mrf.mxu0  ;;  %v1212_v28 = vpop.f32.mrf.mxu1 }
 0x708   : > { %v1230_v3 = vadd.f32 %v1212_v28, %v1093_v63  ;;  %v1097_v6 = vadd.f32 %v1096_v27, %v1027_v16 }
 0x709   : > { %v1100_v30 = vpop.f32.mrf.mxu0  ;;  %v1214_v32 = vpop.f32.mrf.mxu1 }
 0x70a   : > { %v1231_v7 = vadd.f32 %v1214_v32, %v1095_v2  ;;  %v1101_v11 = vadd.f32 %v1100_v30, %v1031_v17 }
 0x70b   : > { %v1102_v34 = vpop.f32.mrf.mxu0  ;;  %v1216_v35 = vpop.f32.mrf.mxu1 }
 0x70c   : > { %v1232_v23 = vadd.f32 %v1216_v35, %v1097_v6  ;;  %v1103_v15 = vadd.f32 %v1102_v34, %v2970_v21 }
 0x70d   : > { %v1104_v39 = vpop.f32.mrf.mxu0  ;;  %v1220_v40 = vpop.f32.mrf.mxu1 }
 0x70e   : > { %v1233_v26 = vadd.f32 %v1220_v40, %v1101_v11  ;;  %v1105_v17 = vadd.f32 %v1104_v39, %v2972_v22  ;;  %v1956_v22 = vpop.permute.xlu1 %1955 }
 0x70f   : > { %v2976_v37 = vpop.f32.mrf.mxu0  ;;  %v1222_v38 = vpop.f32.mrf.mxu1 }
 0x710   : > { %v1234_v30 = vadd.f32 %v1222_v38, %v1103_v15  ;;  %v1107_v34 = vadd.f32 %v2976_v37, %v2974_v24 }
 0x711   : > { %v2978_v41 = vpop.f32.mrf.mxu1  ;;  %v1332_v42 = vpop.f32.mrf.mxu0 }
 0x712   : > { %v1351_v4 = vadd.f32 %v1332_v42, %v1229_v1  ;;  %v1235_v40 = vadd.f32 %v2978_v41, %v1105_v17 }
 0x713   : > { %v2980_v43 = vpop.f32.mrf.mxu1  ;;  %v1334_v44 = vpop.f32.mrf.mxu0 }
 0x714   : > { %v1352_v29 = vadd.f32 %v1334_v44, %v1230_v3 }
 0x715   : > { %v1336_v45 = vpop.f32.mrf.mxu0  ;;  %v1414_v31 = vpop.f32.mrf.mxu1 }
 0x716   : > { %v1433_v9 = vadd.f32 %v1414_v31, %v1351_v4  ;;  %v1353_v14 = vadd.f32 %v1336_v45, %v1231_v7  ;;  %v1961_v7 = vpop.permute.xlu0 %1960 }
 0x717   : > { %v1338_v46 = vpop.f32.mrf.mxu0  ;;  %v1416_v49 = vpop.f32.mrf.mxu1 }
 0x718   : > { %v1434_v25 = vadd.f32 %v1416_v49, %v1352_v29  ;;  %v1354_v16 = vadd.f32 %v1338_v46, %v1232_v23 }
 0x719   : > { %v1342_v50 = vpop.f32.mrf.mxu0  ;;  %v1418_v33 = vpop.f32.mrf.mxu1 }
 0x71a   : > { %v1435_v27 = vadd.f32 %v1418_v33, %v1353_v14  ;;  %v1355_v31 = vadd.f32 %v1342_v50, %v1233_v26 }
 0x71b   : > { %v1344_v47 = vpop.f32.mrf.mxu0  ;;  %v1420_v51 = vpop.f32.mrf.mxu1 }
 0x71c   : > { %v1436_v49 = vadd.f32 %v1420_v51, %v1354_v16  ;;  %v1356_v46 = vadd.f32 %v1344_v47, %v1234_v30  ;;  %v1236_v51 = vadd.f32 %v2980_v43, %v1107_v34 }
 0x71d   : > { %v2982_v52 = vpop.f32.mrf.mxu0  ;;  %v1424_v53 = vpop.f32.mrf.mxu1 }
 0x71e   : > { %v1437_v33 = vadd.f32 %v1424_v53, %v1355_v31  ;;  %v1971_v31 = vpop.permute.xlu0 %1970 }
 0x71f   : > { %v2984_v48 = vpop.f32.mrf.mxu0  ;;  %v2986_v54 = vpop.f32.mrf.mxu1 }
 0x720   : > { %v1358_v3 = vadd.f32 %v2984_v48, %v1236_v51 }
 0x721   : > { %v2988_v10 = vpop.f32.mrf.mxu1  ;;  %v1544_v55 = vpop.f32.mrf.mxu0 }
 0x722   : > { %v1563_v19 = vadd.f32 %v1544_v55, %v1433_v9 }
 0x723   : > { %v2990_v56 = vpop.f32.mrf.mxu1  ;;  %v1546_v57 = vpop.f32.mrf.mxu0 }
 0x724   : > { %v1564_v32 = vadd.f32 %v1546_v57, %v1434_v25 }
 0x725   : > { %v1548_v58 = vpop.f32.mrf.mxu0  ;;  %v1672_v59 = vpop.f32.mrf.mxu1 }
 0x726   : > { %v1691_v44 = vadd.f32 %v1672_v59, %v1563_v19  ;;  %v1565_v55 = vadd.f32 %v1548_v58, %v1435_v27  ;;  %v1357_v58 = vadd.f32 %v2982_v52, %v1235_v40  ;;  %v1966_v19 = vpop.permute.xlu1 %1965 }
 0x727   : > { %v1550_v60 = vpop.f32.mrf.mxu0  ;;  %v1674_v61 = vpop.f32.mrf.mxu1 }
 0x728   : > { %v1692_v62 = vadd.f32 %v1674_v61, %v1564_v32  ;;  %v1566_v39 = vadd.f32 %v1550_v60, %v1436_v49  ;;  %v1438_v61 = vadd.f32 %v2986_v54, %v1356_v46  ;;  %v1439_v60 = vadd.f32 %v2988_v10, %v1357_v58 }
 0x729   : > { %v1554_v8 = vpop.f32.mrf.mxu0  ;;  %v1676_v20 = vpop.f32.mrf.mxu1 }
 0x72a   : > { %v1693_v38 = vadd.f32 %v1676_v20, %v1565_v55  ;;  %v1567_v1 = vadd.f32 %v1554_v8, %v1437_v33 }
 0x72b   : > { %v1556_v36 = vpop.f32.mrf.mxu0  ;;  %v1678_v0 = vpop.f32.mrf.mxu1 }
 0x72c   : > { %v1694_v37 = vadd.f32 %v1678_v0, %v1566_v39  ;;  %v1568_v20 = vadd.f32 %v1556_v36, %v1438_v61  ;;  %v1440_v0 = vadd.f32 %v2990_v56, %v1358_v3 }
 0x72d   : > { %v2992_v5 = vpop.f32.mrf.mxu0  ;;  %v1682_v18 = vpop.f32.mrf.mxu1 }
 0x72e   : > { %v1695_v43 = vadd.f32 %v1682_v18, %v1567_v1  ;;  %v1569_v48 = vadd.f32 %v2992_v5, %v1439_v60 }
 0x72f   : > { %v2994_v12 = vpop.f32.mrf.mxu0  ;;  %v1684_v13 = vpop.f32.mrf.mxu1 }
 0x730   : > { %v1696_v36 = vadd.f32 %v1684_v13, %v1568_v20  ;;  %v1570_v23 = vadd.f32 %v2994_v12, %v1440_v0 }
 0x731   : > { %v2997_v28 = vpop.f32.mrf.mxu1  ;;  %v1794_v42 = vpop.f32.mrf.mxu0 }
 0x732   : > { %v1813_v21 = vadd.f32 %v1794_v42, %v1691_v44  ;;  %v1697_v15 = vadd.f32 %v2997_v28, %v1569_v48 }
 0x733   : > { %v1688_v35 = vpop.f32.mrf.mxu1  ;;  %v1796_v45 = vpop.f32.mrf.mxu0 }
 0x734   : > { %v1814_v50 = vadd.f32 %v1796_v45, %v1692_v62  ;;  %v1698_v16 = vadd.f32 %v1688_v35, %v1570_v23 }
 0x735   : > { %v1798_v57 = vpop.f32.mrf.mxu0  ;;  %v1922_v59 = vpop.f32.mrf.mxu1 }
 0x736   : > { %v1941_v63 = vadd.f32 %v1922_v59, %v1813_v21  ;;  %v1815_v41 = vadd.f32 %v1798_v57, %v1693_v38 }
 0x737   : > { %v1800_v2 = vpop.f32.mrf.mxu0  ;;  %v1924_v24 = vpop.f32.mrf.mxu1 }
 0x738   : > { %v1973_v47 = vadd.f32 %v1956_v22, %v1941_v63  ;;  %v1942_v53 = vadd.f32 %v1924_v24, %v1814_v50  ;;  %v1816_v52 = vadd.f32 %v1800_v2, %v1694_v37 }
 0x739   : > { %v1804_v4 = vpop.f32.mrf.mxu0  ;;  %v1926_v6 = vpop.f32.mrf.mxu1 }
 0x73a   : > { %1981 = vst [vmem:[%s3011_s25] sm:$0xff] %v1973_v47  ;;  %v1974_v54 = vadd.f32 %v1956_v22, %v1942_v53  ;;  %v1943_v8 = vadd.f32 %v1926_v6, %v1815_v41  ;;  %v1817_v9 = vadd.f32 %v1804_v4, %v1695_v43 }
 0x73b   : > { %v1806_v29 = vpop.f32.mrf.mxu0  ;;  %v1928_v10 = vpop.f32.mrf.mxu1 }
 0x73c   : > { %1982 = vst [vmem:[%s3011_s25 + $0x8] sm:$0xff] %v1974_v54  ;;  %v1975_v18 = vadd.f32 %v1961_v7, %v1943_v8  ;;  %v1944_v11 = vadd.f32 %v1928_v10, %v1816_v52  ;;  %v1818_v56 = vadd.f32 %v1806_v29, %v1696_v36 }
 0x73d   : > { %v1808_v14 = vpop.f32.mrf.mxu0  ;;  %v1932_v25 = vpop.f32.mrf.mxu1 }
 0x73e   : > { %1983 = vst [vmem:[%s3011_s25 + $0x10] sm:$0xff] %v1975_v18  ;;  %v1976_v5 = vadd.f32 %v1961_v7, %v1944_v11  ;;  %v1945_v26 = vadd.f32 %v1932_v25, %v1817_v9  ;;  %v1819_v27 = vadd.f32 %v1808_v14, %v1697_v15 }
 0x73f   : > { %v1810_v13 = vpop.f32.mrf.mxu0  ;;  %v1934_v42 = vpop.f32.mrf.mxu1 }
 0x740   : > { %1984 = vst [vmem:[%s3011_s25 + $0x18] sm:$0xff] %v1976_v5  ;;  %v1977_v12 = vadd.f32 %v1966_v19, %v1945_v26  ;;  %v1946_v32 = vadd.f32 %v1934_v42, %v1818_v56  ;;  %v1820_v28 = vadd.f32 %v1810_v13, %v1698_v16 }
 0x741   : > { %v1936_v44 = vpop.f32.mrf.mxu1 }
 0x742   : > { %1985 = vst [vmem:[%s3011_s25 + $0x20] sm:$0xff] %v1977_v12  ;;  %v1978_v17 = vadd.f32 %v1966_v19, %v1946_v32  ;;  %v1947_v30 = vadd.f32 %v1936_v44, %v1819_v27 }
 0x743   : > { %v1938_v45 = vpop.f32.mrf.mxu1 }
 0x744   : > { %1986 = vst [vmem:[%s3011_s25 + $0x28] sm:$0xff] %v1978_v17  ;;  %v1979_v49 = vadd.f32 %v1971_v31, %v1947_v30  ;;  %v1948_v35 = vadd.f32 %v1938_v45, %v1820_v28 }
 0x746   : > { %1987 = vst [vmem:[%s3011_s25 + $0x30] sm:$0xff] %v1979_v49  ;;  %v1980_v55 = vadd.f32 %v1971_v31, %v1948_v35 }
 0x748   : > { %1988 = vst [vmem:[%s3011_s25 + $0x38] sm:$0xff] %v1980_v55 }
 0x749   : > { %2432 = shalt.err (!%p2429_p1)
}
 0x74a   : > { %s2433_s23 = scalar_lea.hbm %s3031_s18, 1024  ;;  %s2437_s10 = scalar_lea.hbm %s3085_s8, 2048 }
 0x74b   : > { %p2434_p2 = scmp.ne.s32.totalorder %s3031_s18, %s2433_s23  ;;  %p2438_p5 = scmp.lt.s32.totalorder %s3031_s18, %s3085_s8 }
 0x74c   : > { %p2439_p6 = scmp.lt.s32.totalorder %s2437_s10, %s2433_s23 }
 0x74d   : > { %p2435_p3 = pnand %p2434_p2, %p3098_p13 }
 0x74e   : > { %p2440_p10 = por %p2439_p6, %p2438_p5 }
 0x74f   : > { %p2436_p9 = pneg %p2435_p3 }
 0x751   : > { %p2441_p12 = pnand %p2440_p10, %p2436_p9 }
 0x753   : > { %2444 = shalt.err (!%p2441_p12)
}
 0x754   : > { %s2505_s9 = smov 256  }
 0x755   : > { %2237 = dma.vmem_to_hbm [thread:$0]  (%p3098_p13), %s3025_s26, 1024, %s3031_s18, %s3036_s17, %s2505_s9, %s2505_s9, %s2496_s21  }
 0x756 PF: > { %p2254_p4 = scmp.ge.s32.totalorder %s2487_s30, 2  ;;  %s2018_s19 = sand.u32 1, %s2475_s27  }
 0x757   : > { %p3099_p7 = scmp.ne.s32.totalorder %s3090_s16, 0  ;;  %s2019_s20 = scalar_lea.sflag [#allocation4], %s2018_s19 }
 0x759   : > { %p2247_p8 = pnand %p2254_p4, %p3099_p7 }
 0x75b   : > { %p2248_p11 = pneg %p2247_p8 }
 0x75d   : > { %2470 = dma.done.wait (%p2248_p11), %s2019_s20, 1024  }
 0x75e   : > { %2472 = vsyncadd (%p2248_p11), %s2019_s20, 4294966272  ;;  %p20_p0 = scmp.ge.s32.totalorder %s2576_s11, 4   ;;  %s3100_s27 = smov %s2479_s28 }
 0x75f   : > { %s3101_s28 = smov %s2483_s29  ;;  %s3102_s29 = smov %s2587_s14 }
 0x760   : > { %s3103_s30 = smov %s2576_s11  ;;  %22 = sbr.rel (!%p20_p0) target bundleno = 5 (0x5), region = 104 }
 0x765   :  { %2024 = vsyncpa [#allocation3], 1 }
 0x766   :  { %2026 = vsyncpa [#allocation3 + $0x1], 1 }
 0x767   :  { %2027 = vsyncpa [#allocation6], 1 }
 0x768   :  { %2028 = vsyncpa [#allocation4], 1 }
 0x769   :  { %2030 = vsyncpa [#allocation4 + $0x1], 1 }

</bundles_post_ra>
